<compile_context>
chip_gen: v6e
topology: v6e:2x2x1
jax: 0.10.0
libtpu: 0.0.40
codegen_flags: <defaults>
</compile_context>

<pallas_src>
import jax
import jax.numpy as jnp
from jax.experimental import pallas as pl
from jax.experimental.pallas import tpu as pltpu

# ----- model hyper-parameters (small, consistent with the module) -----
POINT_DIM = 2
CONTEXT_DIM = 64
HIDDEN = 512
NEG_SLOPE = 0.01                              # torch nn.LeakyReLU default
IN_DIM = 12 * POINT_DIM + CONTEXT_DIM + 1     # 89
OUT_DIM = 12 * POINT_DIM                      # 24
LANE = 128
ROW_ALIGN = 16                                # bf16 sublane packing (16 rows / vreg)

IN_PAD = ((IN_DIM + 1 + LANE - 1) // LANE) * LANE    # 89 data + 1 bias lane -> 128
OUT_PAD = ((OUT_DIM + LANE - 1) // LANE) * LANE      # 24 -> 128


def _round_up(n, m):
    return ((n + m - 1) // m) * m


# --------------------------------------------------------------------------
# Kernel: one (Bblk, 128) bf16 input slab -> 4 fused MXU passes -> (Bblk, 128)
# f32 output slab.  Weights are resident in VMEM (constant index_maps).
# --------------------------------------------------------------------------
def small_mlp_kernel(xc_ref, w1, w2, b2, w3, b3, w4, b4, out_ref):
    f32 = jnp.float32
    bf16 = jnp.bfloat16
    slope = jnp.bfloat16(NEG_SLOPE)

    def leaky(v):
        # LeakyReLU as max(v, a*v), valid for 0 < a < 1; runs in bf16.
        return jnp.maximum(v, slope * v)

    h = xc_ref[...]                                                   # (Bblk, 128) bf16
    # layer 1: b1 is fused into W1 via the constant-1.0 input lane.
    h = leaky(jnp.dot(h, w1[...], preferred_element_type=f32).astype(bf16))
    # layers 2 & 3: f32 MXU accumulate, one cast, bf16 bias + LeakyReLU.
    h = leaky(jnp.dot(h, w2[...], preferred_element_type=f32).astype(bf16) + b2[...])
    h = leaky(jnp.dot(h, w3[...], preferred_element_type=f32).astype(bf16) + b3[...])
    # layer 4: keep the final accumulation / bias / store in f32.
    out_ref[...] = jnp.dot(h, w4[...], preferred_element_type=f32) + b4[...]


# --------------------------------------------------------------------------
# One-time parameter preprocessing (hoisted out of the per-call wrapper).
# --------------------------------------------------------------------------
def prepare_params(params):
    f32, bf16 = jnp.float32, jnp.bfloat16
    w1 = params["w1"].astype(f32)                       # (IN_DIM, 512)
    b1 = params["b1"].reshape(1, -1).astype(f32)        # (1, 512)
    # Fuse b1 as an extra "input row" driven by the constant-1 lane, then pad
    # the concat dim up to IN_PAD with zeros.
    w1p = jnp.concatenate(
        [w1, b1, jnp.zeros((IN_PAD - IN_DIM - 1, HIDDEN), f32)], axis=0
    ).astype(bf16)                                      # (128, 512) bf16
    w2 = params["w2"].astype(bf16)                      # (512, 512)
    w3 = params["w3"].astype(bf16)
    b2 = params["b2"].reshape(1, -1).astype(bf16)       # (1, 512)
    b3 = params["b3"].reshape(1, -1).astype(bf16)
    w4 = jnp.pad(params["w4"].astype(f32),
                 ((0, 0), (0, OUT_PAD - OUT_DIM))).astype(bf16)       # (512, 128)
    b4 = jnp.pad(params["b4"].reshape(1, -1).astype(f32),
                 ((0, 0), (0, OUT_PAD - OUT_DIM)))                    # (1, 128) f32
    return (w1p, w2, b2, w3, b3, w4, b4)


def _choose_bblk(B, block_b):
    """Pick a batch-block size with a nearly-full last block and >=2 grid steps
    when B is moderate (keeps both v7x TensorCores busy on the parallel axis)."""
    n_steps = max(1, -(-B // block_b))
    if n_steps == 1 and B > ROW_ALIGN:
        n_steps = 2
    bblk = _round_up(-(-B // n_steps), ROW_ALIGN)
    n_steps = -(-B // bblk)
    return bblk, n_steps


def small_mlp(x, context, beta, prepared, *, block_b=1024):
    """x: (B, 12, point_dim), context: (B, context_dim), beta: (B,) -> x.shape."""
    w1, w2, b2, w3, b3, w4, b4 = prepared
    B = x.shape[0]
    x_shape = x.shape

    # --- hoisted concat; extra constant-1.0 lane drives the fused b1 ---
    x_flat = x.reshape(B, -1).astype(jnp.float32)
    ctx = context.reshape(B, -1).astype(jnp.float32)
    t = beta.reshape(B, 1).astype(jnp.float32)
    ones = jnp.ones((B, 1), jnp.float32)
    xc = jnp.concatenate([x_flat, ctx, t, ones], axis=1)      # (B, IN_DIM+1)

    in_dim = xc.shape[1]
    out_dim = x_flat.shape[1]

    bblk, n_steps = _choose_bblk(B, block_b)
    b_pad = bblk * n_steps

    xc = jnp.pad(xc, ((0, b_pad - B), (0, IN_PAD - in_dim))).astype(jnp.bfloat16)

    def resident_spec(shape):
        # constant block index -> DMA'd once, resident across all grid steps
        return pl.BlockSpec(shape, lambda i, _nd=len(shape): (0,) * _nd)

    weights = (w1, w2, b2, w3, b3, w4, b4)
    out = pl.pallas_call(
        small_mlp_kernel,
        out_shape=jax.ShapeDtypeStruct((b_pad, OUT_PAD), jnp.float32),
        grid=(n_steps,),
        in_specs=[pl.BlockSpec((bblk, IN_PAD), lambda i: (i, 0))]
                 + [resident_spec(w.shape) for w in weights],
        out_specs=pl.BlockSpec((bblk, OUT_PAD), lambda i: (i, 0)),
        compiler_params=pltpu.CompilerParams(
            dimension_semantics=("parallel",)),
    )(xc, *weights)

    return out[:B, :out_dim].reshape(x_shape)


# --------------------------------------------------------------------------
# Pure-JAX reference with the identical bf16 weight/activation casts.
# --------------------------------------------------------------------------
def small_mlp_reference(x, context, beta, params):
    B = x.shape[0]
    f32, bf16 = jnp.float32, jnp.bfloat16
    slope = jnp.bfloat16(NEG_SLOPE)

    def leaky(v):
        return jnp.maximum(v, slope * v)

    h = jnp.concatenate(
        [x.reshape(B, -1), context.reshape(B, -1), beta.reshape(B, 1)],
        axis=1).astype(bf16)
    h = leaky((jnp.dot(h, params["w1"].astype(bf16), preferred_element_type=f32)
               + params["b1"].astype(bf16).astype(f32)).astype(bf16))
    h = leaky(jnp.dot(h, params["w2"].astype(bf16), preferred_element_type=f32)
              .astype(bf16) + params["b2"].astype(bf16))
    h = leaky(jnp.dot(h, params["w3"].astype(bf16), preferred_element_type=f32)
              .astype(bf16) + params["b3"].astype(bf16))
    h = (jnp.dot(h, params["w4"].astype(bf16), preferred_element_type=f32)
         + params["b4"].astype(f32))
    return h.reshape(x.shape)


def init_params(key):
    """Deterministic synthetic parameters (torch nn.Linear-style init, W as (in, out))."""
    dims = [(IN_DIM, HIDDEN), (HIDDEN, HIDDEN), (HIDDEN, HIDDEN), (HIDDEN, OUT_DIM)]
    params = {}
    for idx, (fi, fo) in enumerate(dims, start=1):
        key, kw, kb = jax.random.split(key, 3)
        bound = fi ** -0.5
        params[f"w{idx}"] = jax.random.uniform(kw, (fi, fo), jnp.float32, -bound, bound)
        params[f"b{idx}"] = jax.random.uniform(kb, (fo,), jnp.float32, -bound, bound)
    return params


if __name__ == "__main__":
    B = 2
    key = jax.random.PRNGKey(0)
    kx, kc, kb, kp = jax.random.split(key, 4)
    x = jax.random.normal(kx, (B, 12, POINT_DIM), jnp.float32)      # trajectory points
    context = jax.random.normal(kc, (B, CONTEXT_DIM), jnp.float32)  # encoder context
    beta = jax.random.uniform(kb, (B,), jnp.float32, 0.1, 1.0)      # diffusion timestep
    params = init_params(kp)

    prepared = prepare_params(params)        # hoisted: pad / bf16 / b1 fusion, once

    out = small_mlp(x, context, beta, prepared)
    out = jax.block_until_ready(out)

    ref = jax.block_until_ready(small_mlp_reference(x, context, beta, params))
    assert out.shape == x.shape
    assert bool(jnp.all(jnp.isfinite(out)))
    assert bool(jnp.allclose(out, ref, atol=1e-2, rtol=1e-2))
    # TODO(synk): if strict fidelity to the f32 torch module is required, also
    # validate against a pure-f32 reference with a wider tolerance.
    print("KERNEL_OK")
</pallas_src>

<mosaic_0001>
module attributes {stable_mosaic.version = 11 : i64} {
  func.func @small_mlp_kernel(%arg0: i32, %arg1: memref<16x128xbf16, #tpu.memory_space<vmem>>, %arg2: memref<128x512xbf16, #tpu.memory_space<vmem>>, %arg3: memref<512x512xbf16, #tpu.memory_space<vmem>>, %arg4: memref<1x512xbf16, #tpu.memory_space<vmem>>, %arg5: memref<512x512xbf16, #tpu.memory_space<vmem>>, %arg6: memref<1x512xbf16, #tpu.memory_space<vmem>>, %arg7: memref<512x128xbf16, #tpu.memory_space<vmem>>, %arg8: memref<1x128xf32, #tpu.memory_space<vmem>>, %arg9: memref<16x128xf32, #tpu.memory_space<vmem>>) attributes {dimension_semantics = [#tpu.dimension_semantics<parallel>], iteration_bounds = array<i64: 1>, scalar_prefetch = 0 : i64, scratch_operands = 0 : i64, tpu.core_type = #tpu.core_type<tc>, window_params = [{transform_indices = @transform_0, window_bounds = array<i64: 16, 128>}, {pipeline_mode = #tpu.pipeline_mode<synchronous>, transform_indices = @transform_1, window_bounds = array<i64: 128, 512>}, {pipeline_mode = #tpu.pipeline_mode<synchronous>, transform_indices = @transform_2, window_bounds = array<i64: 512, 512>}, {pipeline_mode = #tpu.pipeline_mode<synchronous>, transform_indices = @transform_3, window_bounds = array<i64: 1, 512>}, {pipeline_mode = #tpu.pipeline_mode<synchronous>, transform_indices = @transform_4, window_bounds = array<i64: 512, 512>}, {pipeline_mode = #tpu.pipeline_mode<synchronous>, transform_indices = @transform_5, window_bounds = array<i64: 1, 512>}, {pipeline_mode = #tpu.pipeline_mode<synchronous>, transform_indices = @transform_6, window_bounds = array<i64: 512, 128>}, {pipeline_mode = #tpu.pipeline_mode<synchronous>, transform_indices = @transform_7, window_bounds = array<i64: 1, 128>}, {transform_indices = @transform_8, window_bounds = array<i64: 16, 128>}]} {
    %c0 = arith.constant 0 : index
    %c0_0 = arith.constant 0 : index
    %0 = vector.load %arg1[%c0, %c0_0] : memref<16x128xbf16, #tpu.memory_space<vmem>>, vector<16x128xbf16>
    %c0_1 = arith.constant 0 : index
    %c0_2 = arith.constant 0 : index
    %1 = vector.load %arg2[%c0_1, %c0_2] : memref<128x512xbf16, #tpu.memory_space<vmem>>, vector<128x512xbf16>
    %cst = arith.constant dense<0.000000e+00> : vector<16x512xf32>
    %2 = tpu.matmul %0, %1, %cst {dimension_numbers = #tpu.dot_dimension_numbers<[1], [0], [0], [1], [0, 0, 1, 1], [], []>} : vector<16x128xbf16>, vector<128x512xbf16>, vector<16x512xf32> -> vector<16x512xf32>
    %3 = arith.truncf %2 : vector<16x512xf32> to vector<16x512xbf16>
    %cst_3 = arith.constant 1.000980e-02 : bf16
    %4 = vector.broadcast %cst_3 : bf16 to vector<16x512xbf16>
    %5 = arith.mulf %4, %3 : vector<16x512xbf16>
    %6 = arith.maximumf %3, %5 : vector<16x512xbf16>
    %c0_4 = arith.constant 0 : index
    %c0_5 = arith.constant 0 : index
    %7 = vector.load %arg3[%c0_4, %c0_5] : memref<512x512xbf16, #tpu.memory_space<vmem>>, vector<512x512xbf16>
    %cst_6 = arith.constant dense<0.000000e+00> : vector<16x512xf32>
    %8 = tpu.matmul %6, %7, %cst_6 {dimension_numbers = #tpu.dot_dimension_numbers<[1], [0], [0], [1], [0, 0, 1, 1], [], []>} : vector<16x512xbf16>, vector<512x512xbf16>, vector<16x512xf32> -> vector<16x512xf32>
    %9 = arith.truncf %8 : vector<16x512xf32> to vector<16x512xbf16>
    %c0_7 = arith.constant 0 : index
    %c0_8 = arith.constant 0 : index
    %10 = vector.load %arg4[%c0_7, %c0_8] : memref<1x512xbf16, #tpu.memory_space<vmem>>, vector<1x512xbf16>
    %11 = vector.broadcast %10 : vector<1x512xbf16> to vector<16x512xbf16>
    %12 = arith.addf %9, %11 : vector<16x512xbf16>
    %cst_9 = arith.constant 1.000980e-02 : bf16
    %13 = vector.broadcast %cst_9 : bf16 to vector<16x512xbf16>
    %14 = arith.mulf %13, %12 : vector<16x512xbf16>
    %15 = arith.maximumf %12, %14 : vector<16x512xbf16>
    %c0_10 = arith.constant 0 : index
    %c0_11 = arith.constant 0 : index
    %16 = vector.load %arg5[%c0_10, %c0_11] : memref<512x512xbf16, #tpu.memory_space<vmem>>, vector<512x512xbf16>
    %cst_12 = arith.constant dense<0.000000e+00> : vector<16x512xf32>
    %17 = tpu.matmul %15, %16, %cst_12 {dimension_numbers = #tpu.dot_dimension_numbers<[1], [0], [0], [1], [0, 0, 1, 1], [], []>} : vector<16x512xbf16>, vector<512x512xbf16>, vector<16x512xf32> -> vector<16x512xf32>
    %18 = arith.truncf %17 : vector<16x512xf32> to vector<16x512xbf16>
    %c0_13 = arith.constant 0 : index
    %c0_14 = arith.constant 0 : index
    %19 = vector.load %arg6[%c0_13, %c0_14] : memref<1x512xbf16, #tpu.memory_space<vmem>>, vector<1x512xbf16>
    %20 = vector.broadcast %19 : vector<1x512xbf16> to vector<16x512xbf16>
    %21 = arith.addf %18, %20 : vector<16x512xbf16>
    %cst_15 = arith.constant 1.000980e-02 : bf16
    %22 = vector.broadcast %cst_15 : bf16 to vector<16x512xbf16>
    %23 = arith.mulf %22, %21 : vector<16x512xbf16>
    %24 = arith.maximumf %21, %23 : vector<16x512xbf16>
    %c0_16 = arith.constant 0 : index
    %c0_17 = arith.constant 0 : index
    %25 = vector.load %arg7[%c0_16, %c0_17] : memref<512x128xbf16, #tpu.memory_space<vmem>>, vector<512x128xbf16>
    %cst_18 = arith.constant dense<0.000000e+00> : vector<16x128xf32>
    %26 = tpu.matmul %24, %25, %cst_18 {dimension_numbers = #tpu.dot_dimension_numbers<[1], [0], [0], [1], [0, 0, 1, 1], [], []>} : vector<16x512xbf16>, vector<512x128xbf16>, vector<16x128xf32> -> vector<16x128xf32>
    %c0_19 = arith.constant 0 : index
    %c0_20 = arith.constant 0 : index
    %27 = vector.load %arg8[%c0_19, %c0_20] : memref<1x128xf32, #tpu.memory_space<vmem>>, vector<1x128xf32>
    %28 = vector.broadcast %27 : vector<1x128xf32> to vector<16x128xf32>
    %29 = arith.addf %26, %28 : vector<16x128xf32>
    %c0_21 = arith.constant 0 : index
    %c0_22 = arith.constant 0 : index
    %30 = vector.load %arg9[%c0_21, %c0_22] : memref<16x128xf32, #tpu.memory_space<vmem>>, vector<16x128xf32>
    tpu.vector_store %arg9[%c0_21, %c0_22], %29 {strides = array<i32>} : memref<16x128xf32, #tpu.memory_space<vmem>>, vector<16x128xf32>,
    return
  }
  func.func @transform_0(%arg0: i32) -> (i32, i32) {
    %c0_i32 = arith.constant 0 : i32
    %c0_i32_0 = arith.constant 0 : i32
    return %arg0, %c0_i32 : i32, i32
  }
  func.func @transform_1(%arg0: i32) -> (i32, i32) {
    %c0_i32 = arith.constant 0 : i32
    %c0_i32_0 = arith.constant 0 : i32
    %c0_i32_1 = arith.constant 0 : i32
    return %c0_i32, %c0_i32_0 : i32, i32
  }
  func.func @transform_2(%arg0: i32) -> (i32, i32) {
    %c0_i32 = arith.constant 0 : i32
    %c0_i32_0 = arith.constant 0 : i32
    %c0_i32_1 = arith.constant 0 : i32
    return %c0_i32, %c0_i32_0 : i32, i32
  }
  func.func @transform_3(%arg0: i32) -> (i32, i32) {
    %c0_i32 = arith.constant 0 : i32
    %c0_i32_0 = arith.constant 0 : i32
    %c0_i32_1 = arith.constant 0 : i32
    return %c0_i32, %c0_i32_0 : i32, i32
  }
  func.func @transform_4(%arg0: i32) -> (i32, i32) {
    %c0_i32 = arith.constant 0 : i32
    %c0_i32_0 = arith.constant 0 : i32
    %c0_i32_1 = arith.constant 0 : i32
    return %c0_i32, %c0_i32_0 : i32, i32
  }
  func.func @transform_5(%arg0: i32) -> (i32, i32) {
    %c0_i32 = arith.constant 0 : i32
    %c0_i32_0 = arith.constant 0 : i32
    %c0_i32_1 = arith.constant 0 : i32
    return %c0_i32, %c0_i32_0 : i32, i32
  }
  func.func @transform_6(%arg0: i32) -> (i32, i32) {
    %c0_i32 = arith.constant 0 : i32
    %c0_i32_0 = arith.constant 0 : i32
    %c0_i32_1 = arith.constant 0 : i32
    return %c0_i32, %c0_i32_0 : i32, i32
  }
  func.func @transform_7(%arg0: i32) -> (i32, i32) {
    %c0_i32 = arith.constant 0 : i32
    %c0_i32_0 = arith.constant 0 : i32
    %c0_i32_1 = arith.constant 0 : i32
    return %c0_i32, %c0_i32_0 : i32, i32
  }
  func.func @transform_8(%arg0: i32) -> (i32, i32) {
    %c0_i32 = arith.constant 0 : i32
    %c0_i32_0 = arith.constant 0 : i32
    return %arg0, %c0_i32 : i32, i32
  }
}

</mosaic_0001>

<bundles_post_ra>
// kernel: tpu_custom_call.1
= control target key start
LH: loop header
LB: loop body
LE: loop exit
PB: predicated region body
PF: predicated region fallthrough
CT: control target
= control target key end

     0   :  { %13 = vsyncpa [#allocation3], 0  ;;  %s3898_s0 = inlined_call_operand.hbm [shape: bf16[16,128], index: 0, kind: input, shape index: {}]   ;;  %s3899_s1 = inlined_call_operand.hbm [shape: bf16[128,512], index: 1, kind: input, shape index: {}]   ;;  %s3900_s2 = inlined_call_operand.hbm [shape: bf16[512,512], index: 2, kind: input, shape index: {}]   ;;  %s3901_s3 = inlined_call_operand.vmem [shape: bf16[1,512], index: 3, kind: input, shape index: {}]   ;;  %s3902_s4 = inlined_call_operand.hbm [shape: bf16[512,512], index: 4, kind: input, shape index: {}]   ;;  %s3903_s5 = inlined_call_operand.vmem [shape: bf16[1,512], index: 5, kind: input, shape index: {}]   ;;  %s3904_s6 = inlined_call_operand.hbm [shape: bf16[512,128], index: 6, kind: input, shape index: {}]   ;;  %s3905_s7 = inlined_call_operand.vmem [shape: f32[1,128], index: 7, kind: input, shape index: {}]   ;;  %s3906_s8 = inlined_call_operand.hbm [shape: f32[16,128], index: 8, kind: output, shape index: {}]  }
   0x1   :  { %14 = vsyncpa [#allocation6], 0 }
   0x2   :  { %15 = vsyncpa [#allocation9], 0 }
   0x3   :  { %16 = vsyncpa [#allocation4], 0  ;;  %s3759_s27 = smov [#allocation5]  }
   0x4   :  { %s34_s28 = sshll.u32 %s3759_s27, 4  ;;  %s35_s28 = int_to_ptr.vmem [resolvable:$true] %s34_s28 }
   0x5   :  { %s3639_s29 = scalar_lea.vmem %s35_s28, 4096  ;;  %p3644_p1 = scmp.lt.s32.totalorder %s35_s28, %s35_s28 }
   0x6   :  { %p3640_p0 = scmp.ne.s32.totalorder %s35_s28, %s3639_s29  ;;  %p3645_p2 = scmp.lt.s32.totalorder %s3639_s29, %s3639_s29 }
   0x8   :  { %p3646_p3 = por %p3645_p2, %p3644_p1 }
   0xa   :  { %p3647_p4 = pnand %p3646_p3, %p3640_p0 }
   0xc   :  { %3650 = shalt.err (!%p3647_p4)
}
   0xd   :  { %s3760_s30 = smov 256   ;;  %s3761_s9 = smov 16  }
   0xe   :  { %40 = dma.hbm_to_vmem [thread:$0]  %s3899_s1, 4096, %s35_s28, [#allocation6], %s3760_s30, %s3760_s30, %s3761_s9  }
   0xf   :  { %s3762_s12 = smov [#allocation8]   ;;  %s3763_s14 = smov [#allocation2]  }
  0x10   :  { %s60_s13 = sshll.u32 %s3762_s12, 4  ;;  %s22_s15 = sshll.u32 %s3763_s14, 4  ;;  %s61_s13 = int_to_ptr.vmem [resolvable:$true] %s60_s13  ;;  %s23_s15 = int_to_ptr.vmem [resolvable:$true] %s22_s15 }
  0x11   :  { %s3659_s16 = scalar_lea.vmem %s61_s13, 16384  ;;  %p3664_p6 = scmp.lt.s32.totalorder %s61_s13, %s61_s13 }
  0x12   :  { %p3660_p5 = scmp.ne.s32.totalorder %s61_s13, %s3659_s16  ;;  %p3665_p7 = scmp.lt.s32.totalorder %s3659_s16, %s3659_s16 }
  0x14   :  { %p3666_p8 = por %p3665_p7, %p3664_p6 }
  0x16   :  { %p3667_p9 = pnand %p3666_p8, %p3660_p5 }
  0x18   :  { %3670 = shalt.err (!%p3667_p9)
}
  0x19   :  { %66 = dma.hbm_to_vmem [thread:$0]  %s3902_s4, 16384, %s61_s13, [#allocation9], %s3760_s30, %s3760_s30, %s3761_s9  }
  0x1a   :  { %s3679_s1 = scalar_lea.vmem %s23_s15, 128  ;;  %p3684_p11 = scmp.lt.s32.totalorder %s23_s15, %s23_s15 }
  0x1b   :  { %p3680_p10 = scmp.ne.s32.totalorder %s23_s15, %s3679_s1  ;;  %p3685_p12 = scmp.lt.s32.totalorder %s3679_s1, %s3679_s1 }
  0x1d   :  { %p3686_p13 = por %p3685_p12, %p3684_p11 }
  0x1f   :  { %p3687_p0 = pnand %p3686_p13, %p3680_p10 }
  0x21   :  { %3690 = shalt.err (!%p3687_p0)
}
  0x22   :  { %s3764_s19 = smov 64   ;;  %s3765_s20 = smov 4  }
  0x23   :  { %28 = dma.hbm_to_vmem [thread:$0]  %s3898_s0, 128, %s23_s15, [#allocation3], %s3764_s19, %s3764_s19, %s3765_s20  }
  0x24   :  { %s3766_s23 = smov [#allocation7]   ;;  %s3767_s25 = smov [#allocation10]  }
  0x25   :  { %s46_s24 = sshll.u32 %s3766_s23, 4  ;;  %s74_s26 = sshll.u32 %s3767_s25, 4  ;;  %s47_s24 = int_to_ptr.vmem [resolvable:$true] %s46_s24  ;;  %s75_s26 = int_to_ptr.vmem [resolvable:$true] %s74_s26 }
  0x26   :  { %s3699_s4 = scalar_lea.vmem %s47_s24, 16384  ;;  %p3704_p2 = scmp.lt.s32.totalorder %s47_s24, %s47_s24 }
  0x27   :  { %p3700_p1 = scmp.ne.s32.totalorder %s47_s24, %s3699_s4  ;;  %p3705_p3 = scmp.lt.s32.totalorder %s3699_s4, %s3699_s4 }
  0x29   :  { %p3706_p4 = por %p3705_p3, %p3704_p2 }
  0x2b   :  { %p3707_p5 = pnand %p3706_p4, %p3700_p1 }
  0x2d   :  { %3710 = shalt.err (!%p3707_p5)
}
  0x2e   :  { %52 = dma.hbm_to_vmem [thread:$0]  %s3900_s2, 16384, %s47_s24, [#allocation6], %s3760_s30, %s3760_s30, %s3761_s9  }
  0x2f   :  { %s3719_s0 = scalar_lea.vmem %s75_s26, 4096  ;;  %p3724_p7 = scmp.lt.s32.totalorder %s75_s26, %s75_s26 }
  0x30   :  { %p3720_p6 = scmp.ne.s32.totalorder %s75_s26, %s3719_s0  ;;  %p3725_p8 = scmp.lt.s32.totalorder %s3719_s0, %s3719_s0 }
  0x32   :  { %p3726_p9 = por %p3725_p8, %p3724_p7 }
  0x34   :  { %p3727_p10 = pnand %p3726_p9, %p3720_p6 }
  0x36   :  { %3730 = shalt.err (!%p3727_p10)
}
  0x37   :  { %80 = dma.hbm_to_vmem [thread:$0]  %s3904_s6, 4096, %s75_s26, [#allocation9], %s3764_s19, %s3764_s19, %s3765_s20  }
  0x38   :  { %3751 = dma.done.wait [#allocation3], 128  }
  0x39   :  { %3752 = vsyncadd [#allocation3], 4294967168 }
  0x3a   :  { %3753 = dma.done.wait [#allocation6], 20480  }
  0x3b   :  { %3754 = vsyncadd [#allocation6], 4294946816 }
  0x3c   :  { %3755 = dma.done.wait [#allocation9], 20480  }
  0x3d   :  { %3756 = vsyncadd [#allocation9], 4294946816  ;;  %v3768_v0 = vmov 0   ;;  %v3166_v1 = vld [vmem:[#allocation5 + $0xe4] ss:$16 sps:$4 sm:$0xff]   ;;  %v3214_v35 = vld [vmem:[#allocation2] sm:$0xff]  }
  0x3e   :  { %332 = vmatprep.mubr.bf16.mxu0 %v3768_v0  ;;  %375 = vmatprep.mubr.bf16.mxu1 %v3768_v0  ;;  %v3168_v2 = vld [vmem:[#allocation5 + $0xec] ss:$16 sps:$4 sm:$0xff]   ;;  %v3170_v3 = vld [vmem:[#allocation5 + $0xe0] ss:$16 sps:$4 sm:$0xff]   ;;  %v3171_v4 = vld [vmem:[#allocation5 + $0xe8] ss:$16 sps:$4 sm:$0xff]  }
  0x3f   :  { %300 = vmatprep.subr.bf16.mxu0 %v3166_v1  ;;  %343 = vmatprep.subr.bf16.mxu1 %v3168_v2  ;;  %v3172_v5 = vld [vmem:[#allocation5 + $0xc4] ss:$16 sps:$4 sm:$0xff]   ;;  %v3174_v6 = vld [vmem:[#allocation5 + $0xcc] ss:$16 sps:$4 sm:$0xff]   ;;  %v3176_v7 = vld [vmem:[#allocation5 + $0xc0] ss:$16 sps:$4 sm:$0xff]  }
  0x40   :  { %301 = vmatpush1.bf16.msra.mxu0 %v3170_v3  ;;  %344 = vmatpush1.bf16.msra.mxu1 %v3171_v4  ;;  %v3177_v8 = vld [vmem:[#allocation5 + $0xc8] ss:$16 sps:$4 sm:$0xff]   ;;  %v3178_v9 = vld [vmem:[#allocation5 + $0xa4] ss:$16 sps:$4 sm:$0xff]   ;;  %v3180_v10 = vld [vmem:[#allocation5 + $0xac] ss:$16 sps:$4 sm:$0xff]  }
  0x41   :  { %302 = vmatprep.subr.bf16.mxu0 %v3172_v5  ;;  %345 = vmatprep.subr.bf16.mxu1 %v3174_v6  ;;  %v3182_v11 = vld [vmem:[#allocation5 + $0xa0] ss:$16 sps:$4 sm:$0xff]   ;;  %v3183_v12 = vld [vmem:[#allocation5 + $0xa8] ss:$16 sps:$4 sm:$0xff]   ;;  %v3184_v13 = vld [vmem:[#allocation5 + $0x84] ss:$16 sps:$4 sm:$0xff]  }
  0x42   :  { %v3186_v14 = vld [vmem:[#allocation5 + $0x8c] ss:$16 sps:$4 sm:$0xff]   ;;  %v3188_v15 = vld [vmem:[#allocation5 + $0x80] ss:$16 sps:$4 sm:$0xff]   ;;  %v3189_v16 = vld [vmem:[#allocation5 + $0x88] ss:$16 sps:$4 sm:$0xff]  }
  0x43   :  { %v3190_v17 = vld [vmem:[#allocation5 + $0x64] ss:$16 sps:$4 sm:$0xff]   ;;  %v3192_v18 = vld [vmem:[#allocation5 + $0x6c] ss:$16 sps:$4 sm:$0xff]   ;;  %v3194_v19 = vld [vmem:[#allocation5 + $0x60] ss:$16 sps:$4 sm:$0xff]  }
  0x44   :  { %303 = vmatpush1.bf16.msra.mxu0 %v3176_v7  ;;  %346 = vmatpush1.bf16.msra.mxu1 %v3177_v8  ;;  %v3195_v20 = vld [vmem:[#allocation5 + $0x68] ss:$16 sps:$4 sm:$0xff]   ;;  %v3196_v21 = vld [vmem:[#allocation5 + $0x44] ss:$16 sps:$4 sm:$0xff]   ;;  %v3198_v22 = vld [vmem:[#allocation5 + $0x4c] ss:$16 sps:$4 sm:$0xff]  }
  0x45   :  { %304 = vmatprep.subr.bf16.mxu0 %v3178_v9  ;;  %347 = vmatprep.subr.bf16.mxu1 %v3180_v10  ;;  %v3200_v23 = vld [vmem:[#allocation5 + $0x40] ss:$16 sps:$4 sm:$0xff]   ;;  %v3201_v24 = vld [vmem:[#allocation5 + $0x48] ss:$16 sps:$4 sm:$0xff]   ;;  %v3202_v25 = vld [vmem:[#allocation5 + $0x24] ss:$16 sps:$4 sm:$0xff]  }
  0x46   :  { %v3204_v26 = vld [vmem:[#allocation5 + $0x2c] ss:$16 sps:$4 sm:$0xff]   ;;  %v3206_v27 = vld [vmem:[#allocation5 + $0x20] ss:$16 sps:$4 sm:$0xff]   ;;  %v3207_v28 = vld [vmem:[#allocation5 + $0x28] ss:$16 sps:$4 sm:$0xff]  }
  0x47   :  { %v3208_v29 = vld [vmem:[#allocation5 + $0x4] ss:$16 sps:$4 sm:$0xff]   ;;  %v3210_v30 = vld [vmem:[#allocation5 + $0xc] ss:$16 sps:$4 sm:$0xff]   ;;  %v3212_v31 = vld [vmem:[#allocation5] ss:$16 sps:$4 sm:$0xff]  }
  0x48   :  { %305 = vmatpush1.bf16.msra.mxu0 %v3182_v11  ;;  %348 = vmatpush1.bf16.msra.mxu1 %v3183_v12  ;;  %v3213_v32 = vld [vmem:[#allocation5 + $0x8] ss:$16 sps:$4 sm:$0xff]   ;;  %v3217_v33 = vld [vmem:[#allocation7 + $0xe4] ss:$16 sps:$4 sm:$0xff]   ;;  %v3215_v36 = vld [vmem:[#allocation7 + $0xe0] ss:$16 sps:$4 sm:$0xff]  }
  0x49   :  { %306 = vmatprep.subr.bf16.mxu0 %v3184_v13  ;;  %349 = vmatprep.subr.bf16.mxu1 %v3186_v14  ;;  %v3220_v34 = vld [vmem:[#allocation7 + $0x2e4] ss:$16 sps:$4 sm:$0xff]   ;;  %v3218_v37 = vld [vmem:[#allocation7 + $0x2e0] ss:$16 sps:$4 sm:$0xff]   ;;  %s3770_s11 = smov [#allocation11]  }
  0x4a   :  { %v3223_v38 = vld [vmem:[#allocation7 + $0xc4] ss:$16 sps:$4 sm:$0xff]   ;;  %v3221_v40 = vld [vmem:[#allocation7 + $0xc0] ss:$16 sps:$4 sm:$0xff]   ;;  %s2770_s12 = sshll.u32 %s3770_s11, 4  ;;  %s2771_s12 = int_to_ptr.vmem [resolvable:$true] %s2770_s12 }
  0x4b   :  { %v3226_v39 = vld [vmem:[#allocation7 + $0x2c4] ss:$16 sps:$4 sm:$0xff]   ;;  %v3224_v41 = vld [vmem:[#allocation7 + $0x2c0] ss:$16 sps:$4 sm:$0xff]   ;;  %s3731_s13 = scalar_lea.vmem %s2771_s12, 256  ;;  %p3736_p12 = scmp.lt.s32.totalorder %s2771_s12, %s2771_s12 }
  0x4c   :  { %307 = vmatpush1.bf16.msra.mxu0 %v3188_v15  ;;  %350 = vmatpush1.bf16.msra.mxu1 %v3189_v16  ;;  %v3229_v42 = vld [vmem:[#allocation7 + $0xa4] ss:$16 sps:$4 sm:$0xff]   ;;  %v3227_v44 = vld [vmem:[#allocation7 + $0xa0] ss:$16 sps:$4 sm:$0xff]   ;;  %p3732_p11 = scmp.ne.s32.totalorder %s2771_s12, %s3731_s13  ;;  %p3737_p13 = scmp.lt.s32.totalorder %s3731_s13, %s3731_s13 }
  0x4d   :  { %308 = vmatprep.subr.bf16.mxu0 %v3190_v17  ;;  %351 = vmatprep.subr.bf16.mxu1 %v3192_v18  ;;  %v3232_v43 = vld [vmem:[#allocation7 + $0x2a4] ss:$16 sps:$4 sm:$0xff]   ;;  %v3230_v45 = vld [vmem:[#allocation7 + $0x2a0] ss:$16 sps:$4 sm:$0xff]  }
  0x4e   :  { %v3235_v46 = vld [vmem:[#allocation7 + $0x84] ss:$16 sps:$4 sm:$0xff]   ;;  %v3233_v48 = vld [vmem:[#allocation7 + $0x80] ss:$16 sps:$4 sm:$0xff]   ;;  %p3738_p0 = por %p3737_p13, %p3736_p12 }
  0x4f   :  { %v3238_v47 = vld [vmem:[#allocation7 + $0x284] ss:$16 sps:$4 sm:$0xff]   ;;  %v3236_v49 = vld [vmem:[#allocation7 + $0x280] ss:$16 sps:$4 sm:$0xff]  }
  0x50   :  { %309 = vmatpush1.bf16.msra.mxu0 %v3194_v19  ;;  %352 = vmatpush1.bf16.msra.mxu1 %v3195_v20  ;;  %v3241_v50 = vld [vmem:[#allocation7 + $0x64] ss:$16 sps:$4 sm:$0xff]   ;;  %v3239_v52 = vld [vmem:[#allocation7 + $0x60] ss:$16 sps:$4 sm:$0xff]   ;;  %p3739_p1 = pnand %p3738_p0, %p3732_p11 }
  0x51   :  { %310 = vmatprep.subr.bf16.mxu0 %v3196_v21  ;;  %353 = vmatprep.subr.bf16.mxu1 %v3198_v22  ;;  %v3244_v51 = vld [vmem:[#allocation7 + $0x264] ss:$16 sps:$4 sm:$0xff]   ;;  %v3242_v53 = vld [vmem:[#allocation7 + $0x260] ss:$16 sps:$4 sm:$0xff]  }
  0x52   :  { %v3247_v54 = vld [vmem:[#allocation7 + $0x44] ss:$16 sps:$4 sm:$0xff]   ;;  %v3245_v56 = vld [vmem:[#allocation7 + $0x40] ss:$16 sps:$4 sm:$0xff]  }
  0x53   :  { %v3250_v55 = vld [vmem:[#allocation7 + $0x244] ss:$16 sps:$4 sm:$0xff]   ;;  %v3248_v57 = vld [vmem:[#allocation7 + $0x240] ss:$16 sps:$4 sm:$0xff]  }
  0x54   :  { %311 = vmatpush1.bf16.msra.mxu0 %v3200_v23  ;;  %354 = vmatpush1.bf16.msra.mxu1 %v3201_v24  ;;  %v3253_v58 = vld [vmem:[#allocation7 + $0x24] ss:$16 sps:$4 sm:$0xff]   ;;  %v3251_v60 = vld [vmem:[#allocation7 + $0x20] ss:$16 sps:$4 sm:$0xff]  }
  0x55   :  { %312 = vmatprep.subr.bf16.mxu0 %v3202_v25  ;;  %355 = vmatprep.subr.bf16.mxu1 %v3204_v26  ;;  %v3256_v59 = vld [vmem:[#allocation7 + $0x224] ss:$16 sps:$4 sm:$0xff]   ;;  %v3254_v61 = vld [vmem:[#allocation7 + $0x220] ss:$16 sps:$4 sm:$0xff]  }
  0x56   :  { %v3259_v62 = vld [vmem:[#allocation7 + $0x4] ss:$16 sps:$4 sm:$0xff]   ;;  %v3257_v0 = vld [vmem:[#allocation7] ss:$16 sps:$4 sm:$0xff]  }
  0x57   :  { %v3262_v63 = vld [vmem:[#allocation7 + $0x204] ss:$16 sps:$4 sm:$0xff]   ;;  %v3260_v1 = vld [vmem:[#allocation7 + $0x200] ss:$16 sps:$4 sm:$0xff]  }
  0x58   :  { %313 = vmatpush1.bf16.msra.mxu0 %v3206_v27  ;;  %356 = vmatpush1.bf16.msra.mxu1 %v3207_v28  ;;  %v3265_v2 = vld [vmem:[#allocation7 + $0x1e4] ss:$16 sps:$4 sm:$0xff]   ;;  %v3263_v4 = vld [vmem:[#allocation7 + $0x1e0] ss:$16 sps:$4 sm:$0xff]  }
  0x59   :  { %314 = vmatprep.subr.bf16.mxu0 %v3208_v29  ;;  %357 = vmatprep.subr.bf16.mxu1 %v3210_v30  ;;  %v3268_v3 = vld [vmem:[#allocation7 + $0x3e4] ss:$16 sps:$4 sm:$0xff]   ;;  %v3266_v5 = vld [vmem:[#allocation7 + $0x3e0] ss:$16 sps:$4 sm:$0xff]  }
  0x5a   :  { %v3271_v6 = vld [vmem:[#allocation7 + $0x1c4] ss:$16 sps:$4 sm:$0xff]   ;;  %v3269_v8 = vld [vmem:[#allocation7 + $0x1c0] ss:$16 sps:$4 sm:$0xff]  }
  0x5b   :  { %v3274_v7 = vld [vmem:[#allocation7 + $0x3c4] ss:$16 sps:$4 sm:$0xff]   ;;  %v3272_v9 = vld [vmem:[#allocation7 + $0x3c0] ss:$16 sps:$4 sm:$0xff]  }
  0x5c   :  { %315 = vmatpush1.bf16.msra.mxu0 %v3212_v31  ;;  %358 = vmatpush1.bf16.msra.mxu1 %v3213_v32  ;;  %v3277_v10 = vld [vmem:[#allocation7 + $0x1a4] ss:$16 sps:$4 sm:$0xff]   ;;  %v3275_v12 = vld [vmem:[#allocation7 + $0x1a0] ss:$16 sps:$4 sm:$0xff]  }
  0x5d   :  { %1166 = vmatprep.subr.bf16.mxu0 %v3217_v33  ;;  %1209 = vmatprep.subr.bf16.mxu1 %v3220_v34  ;;  %v3280_v11 = vld [vmem:[#allocation7 + $0x3a4] ss:$16 sps:$4 sm:$0xff]   ;;  %v3278_v13 = vld [vmem:[#allocation7 + $0x3a0] ss:$16 sps:$4 sm:$0xff]   ;;  %v3313_v34 = vld [vmem:[#allocation7 + $0xec] ss:$16 sps:$4 sm:$0xff]  }
  0x5e   :  { %v3283_v14 = vld [vmem:[#allocation7 + $0x184] ss:$16 sps:$4 sm:$0xff]   ;;  %v3281_v16 = vld [vmem:[#allocation7 + $0x180] ss:$16 sps:$4 sm:$0xff]  }
  0x5f   :  { %333 = vmatmul.mubr.bf16.vlgmr.msra.gmra.mxu0 %v3214_v35  ;;  %376 = vmatmul.mubr.bf16.vlgmr.msra.gmra.mxu1 %v3214_v35  ;;  %v3286_v15 = vld [vmem:[#allocation7 + $0x384] ss:$16 sps:$4 sm:$0xff]   ;;  %v3284_v17 = vld [vmem:[#allocation7 + $0x380] ss:$16 sps:$4 sm:$0xff]   ;;  %v3316_v35 = vld [vmem:[#allocation7 + $0x2ec] ss:$16 sps:$4 sm:$0xff]  }
  0x60   :  { %1167 = vmatpush1.bf16.msra.mxu0 %v3215_v36  ;;  %1210 = vmatpush1.bf16.msra.mxu1 %v3218_v37  ;;  %v3289_v18 = vld [vmem:[#allocation7 + $0x164] ss:$16 sps:$4 sm:$0xff]   ;;  %v3287_v20 = vld [vmem:[#allocation7 + $0x160] ss:$16 sps:$4 sm:$0xff]  }
  0x61   :  { %1168 = vmatprep.subr.bf16.mxu0 %v3223_v38  ;;  %1211 = vmatprep.subr.bf16.mxu1 %v3226_v39  ;;  %v3292_v19 = vld [vmem:[#allocation7 + $0x364] ss:$16 sps:$4 sm:$0xff]   ;;  %v3290_v21 = vld [vmem:[#allocation7 + $0x360] ss:$16 sps:$4 sm:$0xff]  }
  0x62   :  { %v3295_v22 = vld [vmem:[#allocation7 + $0x144] ss:$16 sps:$4 sm:$0xff]   ;;  %v3293_v24 = vld [vmem:[#allocation7 + $0x140] ss:$16 sps:$4 sm:$0xff]  }
  0x63   :  { %v3298_v23 = vld [vmem:[#allocation7 + $0x344] ss:$16 sps:$4 sm:$0xff]   ;;  %v3296_v25 = vld [vmem:[#allocation7 + $0x340] ss:$16 sps:$4 sm:$0xff]  }
  0x64   :  { %1169 = vmatpush1.bf16.msra.mxu0 %v3221_v40  ;;  %1212 = vmatpush1.bf16.msra.mxu1 %v3224_v41  ;;  %v3301_v26 = vld [vmem:[#allocation7 + $0x124] ss:$16 sps:$4 sm:$0xff]   ;;  %v3299_v28 = vld [vmem:[#allocation7 + $0x120] ss:$16 sps:$4 sm:$0xff]  }
  0x65   :  { %1170 = vmatprep.subr.bf16.mxu0 %v3229_v42  ;;  %1213 = vmatprep.subr.bf16.mxu1 %v3232_v43  ;;  %v3304_v27 = vld [vmem:[#allocation7 + $0x324] ss:$16 sps:$4 sm:$0xff]   ;;  %v3302_v29 = vld [vmem:[#allocation7 + $0x320] ss:$16 sps:$4 sm:$0xff]  }
  0x66   :  { %v3307_v30 = vld [vmem:[#allocation7 + $0x104] ss:$16 sps:$4 sm:$0xff]   ;;  %v3305_v32 = vld [vmem:[#allocation7 + $0x100] ss:$16 sps:$4 sm:$0xff]  }
  0x67   :  { %v3310_v31 = vld [vmem:[#allocation7 + $0x304] ss:$16 sps:$4 sm:$0xff]   ;;  %v3308_v33 = vld [vmem:[#allocation7 + $0x300] ss:$16 sps:$4 sm:$0xff]  }
  0x68   :  { %1171 = vmatpush1.bf16.msra.mxu0 %v3227_v44  ;;  %1214 = vmatpush1.bf16.msra.mxu1 %v3230_v45 }
  0x69   :  { %1172 = vmatprep.subr.bf16.mxu0 %v3235_v46  ;;  %1215 = vmatprep.subr.bf16.mxu1 %v3238_v47 }
  0x6c   :  { %1173 = vmatpush1.bf16.msra.mxu0 %v3233_v48  ;;  %1216 = vmatpush1.bf16.msra.mxu1 %v3236_v49 }
  0x6d   :  { %1174 = vmatprep.subr.bf16.mxu0 %v3241_v50  ;;  %1217 = vmatprep.subr.bf16.mxu1 %v3244_v51 }
  0x70   :  { %1175 = vmatpush1.bf16.msra.mxu0 %v3239_v52  ;;  %1218 = vmatpush1.bf16.msra.mxu1 %v3242_v53 }
  0x71   :  { %1176 = vmatprep.subr.bf16.mxu0 %v3247_v54  ;;  %1219 = vmatprep.subr.bf16.mxu1 %v3250_v55  ;;  %v3311_v54 = vld [vmem:[#allocation7 + $0xe8] ss:$16 sps:$4 sm:$0xff]  }
  0x72   :  { %v3314_v55 = vld [vmem:[#allocation7 + $0x2e8] ss:$16 sps:$4 sm:$0xff]  }
  0x74   :  { %1177 = vmatpush1.bf16.msra.mxu0 %v3245_v56  ;;  %1220 = vmatpush1.bf16.msra.mxu1 %v3248_v57 }
  0x75   :  { %1178 = vmatprep.subr.bf16.mxu0 %v3253_v58  ;;  %1221 = vmatprep.subr.bf16.mxu1 %v3256_v59  ;;  %v3319_v58 = vld [vmem:[#allocation7 + $0xcc] ss:$16 sps:$4 sm:$0xff]  }
  0x76   :  { %v3322_v59 = vld [vmem:[#allocation7 + $0x2cc] ss:$16 sps:$4 sm:$0xff]  }
  0x78   :  { %1179 = vmatpush1.bf16.msra.mxu0 %v3251_v60  ;;  %1222 = vmatpush1.bf16.msra.mxu1 %v3254_v61  ;;  %v3317_v60 = vld [vmem:[#allocation7 + $0xc8] ss:$16 sps:$4 sm:$0xff]  }
  0x79   :  { %1180 = vmatprep.subr.bf16.mxu0 %v3259_v62  ;;  %1223 = vmatprep.subr.bf16.mxu1 %v3262_v63  ;;  %v3320_v61 = vld [vmem:[#allocation7 + $0x2c8] ss:$16 sps:$4 sm:$0xff]   ;;  %v3325_v62 = vld [vmem:[#allocation7 + $0xac] ss:$16 sps:$4 sm:$0xff]  }
  0x7a   :  { %v3328_v63 = vld [vmem:[#allocation7 + $0x2ac] ss:$16 sps:$4 sm:$0xff]  }
  0x7c   :  { %1181 = vmatpush1.bf16.msra.mxu0 %v3257_v0  ;;  %1224 = vmatpush1.bf16.msra.mxu1 %v3260_v1  ;;  %v3323_v0 = vld [vmem:[#allocation7 + $0xa8] ss:$16 sps:$4 sm:$0xff]  }
  0x7d   :  { %1182 = vmatprep.subr.bf16.mxu0 %v3265_v2  ;;  %1225 = vmatprep.subr.bf16.mxu1 %v3268_v3  ;;  %v3326_v1 = vld [vmem:[#allocation7 + $0x2a8] ss:$16 sps:$4 sm:$0xff]   ;;  %v3331_v2 = vld [vmem:[#allocation7 + $0x8c] ss:$16 sps:$4 sm:$0xff]  }
  0x7e   :  { %v3334_v3 = vld [vmem:[#allocation7 + $0x28c] ss:$16 sps:$4 sm:$0xff]  }
  0x80   :  { %1183 = vmatpush2.bf16.msra.mxu0 %v3263_v4  ;;  %1226 = vmatpush2.bf16.msra.mxu1 %v3266_v5  ;;  %v3329_v4 = vld [vmem:[#allocation7 + $0x88] ss:$16 sps:$4 sm:$0xff]  }
  0x81   :  { %1184 = vmatprep.subr.bf16.mxu0 %v3271_v6  ;;  %1227 = vmatprep.subr.bf16.mxu1 %v3274_v7  ;;  %v3332_v5 = vld [vmem:[#allocation7 + $0x288] ss:$16 sps:$4 sm:$0xff]   ;;  %v3337_v6 = vld [vmem:[#allocation7 + $0x6c] ss:$16 sps:$4 sm:$0xff]  }
  0x82   :  { %v3340_v7 = vld [vmem:[#allocation7 + $0x26c] ss:$16 sps:$4 sm:$0xff]  }
  0x84   :  { %1185 = vmatpush2.bf16.msra.mxu0 %v3269_v8  ;;  %1228 = vmatpush2.bf16.msra.mxu1 %v3272_v9  ;;  %v3335_v8 = vld [vmem:[#allocation7 + $0x68] ss:$16 sps:$4 sm:$0xff]  }
  0x85   :  { %1186 = vmatprep.subr.bf16.mxu0 %v3277_v10  ;;  %1229 = vmatprep.subr.bf16.mxu1 %v3280_v11  ;;  %v3338_v9 = vld [vmem:[#allocation7 + $0x268] ss:$16 sps:$4 sm:$0xff]   ;;  %v3343_v10 = vld [vmem:[#allocation7 + $0x4c] ss:$16 sps:$4 sm:$0xff]  }
  0x86   :  { %v3346_v11 = vld [vmem:[#allocation7 + $0x24c] ss:$16 sps:$4 sm:$0xff]  }
  0x88   :  { %1187 = vmatpush2.bf16.msra.mxu0 %v3275_v12  ;;  %1230 = vmatpush2.bf16.msra.mxu1 %v3278_v13  ;;  %v3341_v12 = vld [vmem:[#allocation7 + $0x48] ss:$16 sps:$4 sm:$0xff]  }
  0x89   :  { %1188 = vmatprep.subr.bf16.mxu0 %v3283_v14  ;;  %1231 = vmatprep.subr.bf16.mxu1 %v3286_v15  ;;  %v3344_v13 = vld [vmem:[#allocation7 + $0x248] ss:$16 sps:$4 sm:$0xff]   ;;  %v3349_v14 = vld [vmem:[#allocation7 + $0x2c] ss:$16 sps:$4 sm:$0xff]  }
  0x8a   :  { %v3352_v15 = vld [vmem:[#allocation7 + $0x22c] ss:$16 sps:$4 sm:$0xff]  }
  0x8c   :  { %1189 = vmatpush2.bf16.msra.mxu0 %v3281_v16  ;;  %1232 = vmatpush2.bf16.msra.mxu1 %v3284_v17  ;;  %v3347_v16 = vld [vmem:[#allocation7 + $0x28] ss:$16 sps:$4 sm:$0xff]  }
  0x8d   :  { %1190 = vmatprep.subr.bf16.mxu0 %v3289_v18  ;;  %1233 = vmatprep.subr.bf16.mxu1 %v3292_v19  ;;  %v3350_v17 = vld [vmem:[#allocation7 + $0x228] ss:$16 sps:$4 sm:$0xff]   ;;  %v3355_v18 = vld [vmem:[#allocation7 + $0xc] ss:$16 sps:$4 sm:$0xff]  }
  0x8e   :  { %v3358_v19 = vld [vmem:[#allocation7 + $0x20c] ss:$16 sps:$4 sm:$0xff]  }
  0x90   :  { %1191 = vmatpush2.bf16.msra.mxu0 %v3287_v20  ;;  %1234 = vmatpush2.bf16.msra.mxu1 %v3290_v21  ;;  %v3353_v20 = vld [vmem:[#allocation7 + $0x8] ss:$16 sps:$4 sm:$0xff]  }
  0x91   :  { %1192 = vmatprep.subr.bf16.mxu0 %v3295_v22  ;;  %1235 = vmatprep.subr.bf16.mxu1 %v3298_v23  ;;  %v3356_v21 = vld [vmem:[#allocation7 + $0x208] ss:$16 sps:$4 sm:$0xff]   ;;  %v3361_v22 = vld [vmem:[#allocation7 + $0x1ec] ss:$16 sps:$4 sm:$0xff]  }
  0x92   :  { %v3364_v23 = vld [vmem:[#allocation7 + $0x3ec] ss:$16 sps:$4 sm:$0xff]  }
  0x94   :  { %1193 = vmatpush2.bf16.msra.mxu0 %v3293_v24  ;;  %1236 = vmatpush2.bf16.msra.mxu1 %v3296_v25  ;;  %v3359_v24 = vld [vmem:[#allocation7 + $0x1e8] ss:$16 sps:$4 sm:$0xff]  }
  0x95   :  { %1194 = vmatprep.subr.bf16.mxu0 %v3301_v26  ;;  %1237 = vmatprep.subr.bf16.mxu1 %v3304_v27  ;;  %v3362_v25 = vld [vmem:[#allocation7 + $0x3e8] ss:$16 sps:$4 sm:$0xff]   ;;  %v3367_v26 = vld [vmem:[#allocation7 + $0x1cc] ss:$16 sps:$4 sm:$0xff]  }
  0x96   :  { %v3370_v27 = vld [vmem:[#allocation7 + $0x3cc] ss:$16 sps:$4 sm:$0xff]  }
  0x98   :  { %1195 = vmatpush2.bf16.msra.mxu0 %v3299_v28  ;;  %1238 = vmatpush2.bf16.msra.mxu1 %v3302_v29  ;;  %v3365_v28 = vld [vmem:[#allocation7 + $0x1c8] ss:$16 sps:$4 sm:$0xff]  }
  0x99   :  { %1196 = vmatprep.subr.bf16.mxu0 %v3307_v30  ;;  %1239 = vmatprep.subr.bf16.mxu1 %v3310_v31  ;;  %v3368_v29 = vld [vmem:[#allocation7 + $0x3c8] ss:$16 sps:$4 sm:$0xff]   ;;  %v3373_v30 = vld [vmem:[#allocation7 + $0x1ac] ss:$16 sps:$4 sm:$0xff]  }
  0x9a   :  { %v3376_v31 = vld [vmem:[#allocation7 + $0x3ac] ss:$16 sps:$4 sm:$0xff]  }
  0x9c   :  { %1197 = vmatpush2.bf16.msra.mxu0 %v3305_v32  ;;  %1240 = vmatpush2.bf16.msra.mxu1 %v3308_v33  ;;  %v3371_v32 = vld [vmem:[#allocation7 + $0x1a8] ss:$16 sps:$4 sm:$0xff]  }
  0x9d   :  { %1252 = vmatprep.subr.bf16.mxu0 %v3313_v34  ;;  %1295 = vmatprep.subr.bf16.mxu1 %v3316_v35  ;;  %v3374_v33 = vld [vmem:[#allocation7 + $0x3a8] ss:$16 sps:$4 sm:$0xff]   ;;  %v3379_v34 = vld [vmem:[#allocation7 + $0x18c] ss:$16 sps:$4 sm:$0xff]  }
  0x9e   :  { %v3382_v35 = vld [vmem:[#allocation7 + $0x38c] ss:$16 sps:$4 sm:$0xff]  }
 0x11f   :  { %v334_v36 = vpop.f32.mrf.mxu0  ;;  %v377_v37 = vpop.f32.mrf.mxu1 }
 0x121   :  { %v336_v38 = vpop.f32.mrf.mxu0  ;;  %v379_v39 = vpop.f32.mrf.mxu1 }
 0x123   :  { %v338_v40 = vpop.f32.mrf.mxu0  ;;  %v381_v41 = vpop.f32.mrf.mxu1 }
 0x124   :  { %v386_v42 = vpack.c.bf16 %v338_v40, %v334_v36  ;;  %v388_v43 = vpack.c.bf16 %v381_v41, %v377_v37  ;;  %v3377_v36 = vld [vmem:[#allocation7 + $0x188] ss:$16 sps:$4 sm:$0xff]  }
 0x125   :  { %v340_v44 = vpop.f32.mrf.mxu0  ;;  %v383_v45 = vpop.f32.mrf.mxu1  ;;  %v3380_v37 = vld [vmem:[#allocation7 + $0x388] ss:$16 sps:$4 sm:$0xff]  }
 0x126   :  { %v387_v46 = vpack.c.bf16 %v340_v44, %v336_v38  ;;  %v389_v47 = vpack.c.bf16 %v383_v45, %v379_v39  ;;  %v390_v48 = vmul.bf16 1009007652, %v386_v42  ;;  %v392_v49 = vmul.bf16 1009007652, %v388_v43  ;;  %v3385_v38 = vld [vmem:[#allocation7 + $0x16c] ss:$16 sps:$4 sm:$0xff]  }
 0x127   :  { %v3388_v39 = vld [vmem:[#allocation7 + $0x36c] ss:$16 sps:$4 sm:$0xff]   ;;  %v3383_v40 = vld [vmem:[#allocation7 + $0x168] ss:$16 sps:$4 sm:$0xff]  }
 0x128   :  { %v391_v50 = vmul.bf16 1009007652, %v387_v46  ;;  %v393_v51 = vmul.bf16 1009007652, %v389_v47  ;;  %v3842_v56 = vmax.bf16 %v390_v48, %v386_v42  ;;  %v3844_v57 = vmax.bf16 %v392_v49, %v388_v43  ;;  %v3386_v41 = vld [vmem:[#allocation7 + $0x368] ss:$16 sps:$4 sm:$0xff]  }
 0x129   :  { %v3391_v42 = vld [vmem:[#allocation7 + $0x14c] ss:$16 sps:$4 sm:$0xff]   ;;  %v3389_v44 = vld [vmem:[#allocation7 + $0x148] ss:$16 sps:$4 sm:$0xff]  }
 0x12a   :  { %v395_v52 = vmax.bf16 %v391_v50, %v387_v46  ;;  %v397_v53 = vmax.bf16 %v393_v51, %v389_v47  ;;  %v3394_v43 = vld [vmem:[#allocation7 + $0x34c] ss:$16 sps:$4 sm:$0xff]   ;;  %v3392_v45 = vld [vmem:[#allocation7 + $0x348] ss:$16 sps:$4 sm:$0xff]  }
 0x12b   :  { %v3397_v46 = vld [vmem:[#allocation7 + $0x12c] ss:$16 sps:$4 sm:$0xff]   ;;  %v3395_v48 = vld [vmem:[#allocation7 + $0x128] ss:$16 sps:$4 sm:$0xff]  }
 0x12c   :  { %1198 = vmatprep.mubr.bf16.mxu0 %v395_v52  ;;  %1241 = vmatprep.mubr.bf16.mxu1 %v397_v53  ;;  %v3400_v47 = vld [vmem:[#allocation7 + $0x32c] ss:$16 sps:$4 sm:$0xff]   ;;  %v3398_v49 = vld [vmem:[#allocation7 + $0x328] ss:$16 sps:$4 sm:$0xff]  }
 0x12d   :  { %1199 = vmatmul.mubr.bf16.vlgmr.msra.gmra.mxu0 %v3842_v56  ;;  %1242 = vmatmul.mubr.bf16.vlgmr.msra.gmra.mxu1 %v3844_v57  ;;  %v3403_v50 = vld [vmem:[#allocation7 + $0x10c] ss:$16 sps:$4 sm:$0xff]  }
 0x12e   :  { %1253 = vmatpush1.bf16.msra.mxu0 %v3311_v54  ;;  %1296 = vmatpush1.bf16.msra.mxu1 %v3314_v55  ;;  %v3406_v51 = vld [vmem:[#allocation7 + $0x30c] ss:$16 sps:$4 sm:$0xff]   ;;  %v3409_v54 = vld [vmem:[#allocation8 + $0xe4] ss:$16 sps:$4 sm:$0xff]   ;;  %v3407_v55 = vld [vmem:[#allocation8 + $0xe0] ss:$16 sps:$4 sm:$0xff]  }
 0x12f   :  { %1284 = vmatprep.mubr.bf16.mxu0 %v395_v52  ;;  %1327 = vmatprep.mubr.bf16.mxu1 %v397_v53  ;;  %v3401_v52 = vld [vmem:[#allocation7 + $0x108] ss:$16 sps:$4 sm:$0xff]  }
 0x130   :  { %1254 = vmatprep.subr.bf16.mxu0 %v3319_v58  ;;  %1297 = vmatprep.subr.bf16.mxu1 %v3322_v59  ;;  %v3404_v53 = vld [vmem:[#allocation7 + $0x308] ss:$16 sps:$4 sm:$0xff]   ;;  %v3412_v58 = vld [vmem:[#allocation8 + $0xc4] ss:$16 sps:$4 sm:$0xff]   ;;  %v3410_v59 = vld [vmem:[#allocation8 + $0xc0] ss:$16 sps:$4 sm:$0xff]  }
 0x132   :  { %1255 = vmatpush1.bf16.msra.mxu0 %v3317_v60  ;;  %1298 = vmatpush1.bf16.msra.mxu1 %v3320_v61  ;;  %v3415_v60 = vld [vmem:[#allocation8 + $0xa4] ss:$16 sps:$4 sm:$0xff]   ;;  %v3413_v61 = vld [vmem:[#allocation8 + $0xa0] ss:$16 sps:$4 sm:$0xff]  }
 0x133   :  { %1256 = vmatprep.subr.bf16.mxu0 %v3325_v62  ;;  %1299 = vmatprep.subr.bf16.mxu1 %v3328_v63  ;;  %v3418_v62 = vld [vmem:[#allocation8 + $0x84] ss:$16 sps:$4 sm:$0xff]   ;;  %v3416_v63 = vld [vmem:[#allocation8 + $0x80] ss:$16 sps:$4 sm:$0xff]  }
 0x136   :  { %1257 = vmatpush1.bf16.msra.mxu0 %v3323_v0  ;;  %1300 = vmatpush1.bf16.msra.mxu1 %v3326_v1  ;;  %v3421_v0 = vld [vmem:[#allocation8 + $0x64] ss:$16 sps:$4 sm:$0xff]   ;;  %v3419_v1 = vld [vmem:[#allocation8 + $0x60] ss:$16 sps:$4 sm:$0xff]  }
 0x137   :  { %1258 = vmatprep.subr.bf16.mxu0 %v3331_v2  ;;  %1301 = vmatprep.subr.bf16.mxu1 %v3334_v3  ;;  %v3455_v2 = vld [vmem:[#allocation8 + $0x2e0] ss:$16 sps:$4 sm:$0xff]   ;;  %v3457_v3 = vld [vmem:[#allocation8 + $0x2e4] ss:$16 sps:$4 sm:$0xff]  }
 0x13a   :  { %1259 = vmatpush1.bf16.msra.mxu0 %v3329_v4  ;;  %1302 = vmatpush1.bf16.msra.mxu1 %v3332_v5  ;;  %v3427_v4 = vld [vmem:[#allocation8 + $0x24] ss:$16 sps:$4 sm:$0xff]   ;;  %v3461_v5 = vld [vmem:[#allocation8 + $0x2c0] ss:$16 sps:$4 sm:$0xff]  }
 0x13b   :  { %1260 = vmatprep.subr.bf16.mxu0 %v3337_v6  ;;  %1303 = vmatprep.subr.bf16.mxu1 %v3340_v7  ;;  %v3463_v6 = vld [vmem:[#allocation8 + $0x2c4] ss:$16 sps:$4 sm:$0xff]   ;;  %v3425_v7 = vld [vmem:[#allocation8 + $0x20] ss:$16 sps:$4 sm:$0xff]  }
 0x13e   :  { %1261 = vmatpush1.bf16.msra.mxu0 %v3335_v8  ;;  %1304 = vmatpush1.bf16.msra.mxu1 %v3338_v9  ;;  %v3430_v8 = vld [vmem:[#allocation8 + $0x4] ss:$16 sps:$4 sm:$0xff]   ;;  %v3467_v9 = vld [vmem:[#allocation8 + $0x2a0] ss:$16 sps:$4 sm:$0xff]  }
 0x13f   :  { %1262 = vmatprep.subr.bf16.mxu0 %v3343_v10  ;;  %1305 = vmatprep.subr.bf16.mxu1 %v3346_v11  ;;  %v3469_v10 = vld [vmem:[#allocation8 + $0x2a4] ss:$16 sps:$4 sm:$0xff]   ;;  %v3428_v11 = vld [vmem:[#allocation8] ss:$16 sps:$4 sm:$0xff]  }
 0x142   :  { %1263 = vmatpush1.bf16.msra.mxu0 %v3341_v12  ;;  %1306 = vmatpush1.bf16.msra.mxu1 %v3344_v13  ;;  %v3433_v12 = vld [vmem:[#allocation8 + $0x1e4] ss:$16 sps:$4 sm:$0xff]   ;;  %v3473_v13 = vld [vmem:[#allocation8 + $0x280] ss:$16 sps:$4 sm:$0xff]  }
 0x143   :  { %1264 = vmatprep.subr.bf16.mxu0 %v3349_v14  ;;  %1307 = vmatprep.subr.bf16.mxu1 %v3352_v15  ;;  %v3475_v14 = vld [vmem:[#allocation8 + $0x284] ss:$16 sps:$4 sm:$0xff]   ;;  %v3431_v15 = vld [vmem:[#allocation8 + $0x1e0] ss:$16 sps:$4 sm:$0xff]  }
 0x146   :  { %1265 = vmatpush1.bf16.msra.mxu0 %v3347_v16  ;;  %1308 = vmatpush1.bf16.msra.mxu1 %v3350_v17  ;;  %v3436_v16 = vld [vmem:[#allocation8 + $0x1c4] ss:$16 sps:$4 sm:$0xff]   ;;  %v3479_v17 = vld [vmem:[#allocation8 + $0x260] ss:$16 sps:$4 sm:$0xff]  }
 0x147   :  { %1266 = vmatprep.subr.bf16.mxu0 %v3355_v18  ;;  %1309 = vmatprep.subr.bf16.mxu1 %v3358_v19  ;;  %v3481_v18 = vld [vmem:[#allocation8 + $0x264] ss:$16 sps:$4 sm:$0xff]   ;;  %v3434_v19 = vld [vmem:[#allocation8 + $0x1c0] ss:$16 sps:$4 sm:$0xff]  }
 0x14a   :  { %1267 = vmatpush1.bf16.msra.mxu0 %v3353_v20  ;;  %1310 = vmatpush1.bf16.msra.mxu1 %v3356_v21  ;;  %v3439_v20 = vld [vmem:[#allocation8 + $0x1a4] ss:$16 sps:$4 sm:$0xff]   ;;  %v3485_v21 = vld [vmem:[#allocation8 + $0x240] ss:$16 sps:$4 sm:$0xff]  }
 0x14b   :  { %1268 = vmatprep.subr.bf16.mxu0 %v3361_v22  ;;  %1311 = vmatprep.subr.bf16.mxu1 %v3364_v23  ;;  %v3487_v22 = vld [vmem:[#allocation8 + $0x244] ss:$16 sps:$4 sm:$0xff]   ;;  %v3437_v23 = vld [vmem:[#allocation8 + $0x1a0] ss:$16 sps:$4 sm:$0xff]  }
 0x14e   :  { %1269 = vmatpush2.bf16.msra.mxu0 %v3359_v24  ;;  %1312 = vmatpush2.bf16.msra.mxu1 %v3362_v25  ;;  %v3442_v24 = vld [vmem:[#allocation8 + $0x184] ss:$16 sps:$4 sm:$0xff]   ;;  %v3491_v25 = vld [vmem:[#allocation8 + $0x220] ss:$16 sps:$4 sm:$0xff]  }
 0x14f   :  { %1270 = vmatprep.subr.bf16.mxu0 %v3367_v26  ;;  %1313 = vmatprep.subr.bf16.mxu1 %v3370_v27  ;;  %v3493_v26 = vld [vmem:[#allocation8 + $0x224] ss:$16 sps:$4 sm:$0xff]   ;;  %v3440_v27 = vld [vmem:[#allocation8 + $0x180] ss:$16 sps:$4 sm:$0xff]  }
 0x152   :  { %1271 = vmatpush2.bf16.msra.mxu0 %v3365_v28  ;;  %1314 = vmatpush2.bf16.msra.mxu1 %v3368_v29  ;;  %v3445_v28 = vld [vmem:[#allocation8 + $0x164] ss:$16 sps:$4 sm:$0xff]   ;;  %v3497_v29 = vld [vmem:[#allocation8 + $0x200] ss:$16 sps:$4 sm:$0xff]  }
 0x153   :  { %1272 = vmatprep.subr.bf16.mxu0 %v3373_v30  ;;  %1315 = vmatprep.subr.bf16.mxu1 %v3376_v31  ;;  %v3499_v30 = vld [vmem:[#allocation8 + $0x204] ss:$16 sps:$4 sm:$0xff]   ;;  %v3443_v31 = vld [vmem:[#allocation8 + $0x160] ss:$16 sps:$4 sm:$0xff]  }
 0x156   :  { %1273 = vmatpush2.bf16.msra.mxu0 %v3371_v32  ;;  %1316 = vmatpush2.bf16.msra.mxu1 %v3374_v33  ;;  %v3448_v32 = vld [vmem:[#allocation8 + $0x144] ss:$16 sps:$4 sm:$0xff]   ;;  %v3503_v33 = vld [vmem:[#allocation8 + $0x3e0] ss:$16 sps:$4 sm:$0xff]  }
 0x157   :  { %1274 = vmatprep.subr.bf16.mxu0 %v3379_v34  ;;  %1317 = vmatprep.subr.bf16.mxu1 %v3382_v35  ;;  %v3505_v34 = vld [vmem:[#allocation8 + $0x3e4] ss:$16 sps:$4 sm:$0xff]   ;;  %v3446_v35 = vld [vmem:[#allocation8 + $0x140] ss:$16 sps:$4 sm:$0xff]  }
 0x15a   :  { %1275 = vmatpush2.bf16.msra.mxu0 %v3377_v36  ;;  %1318 = vmatpush2.bf16.msra.mxu1 %v3380_v37  ;;  %v3451_v36 = vld [vmem:[#allocation8 + $0x124] ss:$16 sps:$4 sm:$0xff]   ;;  %v3509_v37 = vld [vmem:[#allocation8 + $0x3c0] ss:$16 sps:$4 sm:$0xff]  }
 0x15b   :  { %1276 = vmatprep.subr.bf16.mxu0 %v3385_v38  ;;  %1319 = vmatprep.subr.bf16.mxu1 %v3388_v39  ;;  %v3511_v38 = vld [vmem:[#allocation8 + $0x3c4] ss:$16 sps:$4 sm:$0xff]   ;;  %v3449_v39 = vld [vmem:[#allocation8 + $0x120] ss:$16 sps:$4 sm:$0xff]  }
 0x15e   :  { %1277 = vmatpush2.bf16.msra.mxu0 %v3383_v40  ;;  %1320 = vmatpush2.bf16.msra.mxu1 %v3386_v41  ;;  %v3454_v40 = vld [vmem:[#allocation8 + $0x104] ss:$16 sps:$4 sm:$0xff]   ;;  %v3515_v41 = vld [vmem:[#allocation8 + $0x3a0] ss:$16 sps:$4 sm:$0xff]  }
 0x15f   :  { %1278 = vmatprep.subr.bf16.mxu0 %v3391_v42  ;;  %1321 = vmatprep.subr.bf16.mxu1 %v3394_v43  ;;  %v3517_v42 = vld [vmem:[#allocation8 + $0x3a4] ss:$16 sps:$4 sm:$0xff]   ;;  %v3452_v43 = vld [vmem:[#allocation8 + $0x100] ss:$16 sps:$4 sm:$0xff]  }
 0x162   :  { %1279 = vmatpush2.bf16.msra.mxu0 %v3389_v44  ;;  %1322 = vmatpush2.bf16.msra.mxu1 %v3392_v45  ;;  %v3460_v44 = vld [vmem:[#allocation8 + $0xec] ss:$16 sps:$4 sm:$0xff]   ;;  %v3521_v45 = vld [vmem:[#allocation8 + $0x380] ss:$16 sps:$4 sm:$0xff]  }
 0x163   :  { %1280 = vmatprep.subr.bf16.mxu0 %v3397_v46  ;;  %1323 = vmatprep.subr.bf16.mxu1 %v3400_v47  ;;  %v3523_v46 = vld [vmem:[#allocation8 + $0x384] ss:$16 sps:$4 sm:$0xff]  }
 0x164   :  { %v3529_v47 = vld [vmem:[#allocation8 + $0x364] ss:$16 sps:$4 sm:$0xff]  }
 0x166   :  { %1281 = vmatpush2.bf16.msra.mxu0 %v3395_v48  ;;  %1324 = vmatpush2.bf16.msra.mxu1 %v3398_v49  ;;  %v3527_v48 = vld [vmem:[#allocation8 + $0x360] ss:$16 sps:$4 sm:$0xff]   ;;  %v3535_v49 = vld [vmem:[#allocation8 + $0x344] ss:$16 sps:$4 sm:$0xff]  }
 0x167   :  { %1282 = vmatprep.subr.bf16.mxu0 %v3403_v50  ;;  %1325 = vmatprep.subr.bf16.mxu1 %v3406_v51  ;;  %v3533_v50 = vld [vmem:[#allocation8 + $0x340] ss:$16 sps:$4 sm:$0xff]   ;;  %v3541_v51 = vld [vmem:[#allocation8 + $0x324] ss:$16 sps:$4 sm:$0xff]  }
 0x16a   :  { %1283 = vmatpush2.bf16.msra.mxu0 %v3401_v52  ;;  %1326 = vmatpush2.bf16.msra.mxu1 %v3404_v53  ;;  %v3539_v52 = vld [vmem:[#allocation8 + $0x320] ss:$16 sps:$4 sm:$0xff]   ;;  %v3547_v53 = vld [vmem:[#allocation8 + $0x304] ss:$16 sps:$4 sm:$0xff]  }
 0x16b   :  { %2176 = vmatprep.subr.bf16.mxu0 %v3409_v54  ;;  %2219 = vmatprep.subr.bf16.mxu1 %v3457_v3  ;;  %v3545_v54 = vld [vmem:[#allocation8 + $0x300] ss:$16 sps:$4 sm:$0xff]  }
 0x16d   :  { %1285 = vmatmul.mubr.bf16.vlgmr.msra.gmra.mxu0 %v3842_v56  ;;  %1328 = vmatmul.mubr.bf16.vlgmr.msra.gmra.mxu1 %v3844_v57  ;;  %v3424_v56 = vld [vmem:[#allocation8 + $0x44] ss:$16 sps:$4 sm:$0xff]   ;;  %v3422_v57 = vld [vmem:[#allocation8 + $0x40] ss:$16 sps:$4 sm:$0xff]  }
 0x16e   :  { %2177 = vmatpush1.bf16.msra.mxu0 %v3407_v55  ;;  %2220 = vmatpush1.bf16.msra.mxu1 %v3455_v2  ;;  %v3553_v55 = vld [vmem:[#allocation8 + $0x2ec] ss:$16 sps:$4 sm:$0xff]  }
 0x16f   :  { %2178 = vmatprep.subr.bf16.mxu0 %v3412_v58  ;;  %2221 = vmatprep.subr.bf16.mxu1 %v3463_v6  ;;  %v3769_v58 = vmov 1966171168  }
 0x172   :  { %2179 = vmatpush1.bf16.msra.mxu0 %v3410_v59  ;;  %2222 = vmatpush1.bf16.msra.mxu1 %v3461_v5  ;;  %v1353_v59 = vunpack.c.l.s4 %v3769_v58  ;;  %v3538_v58 = vld [vmem:[#allocation8 + $0x14c] ss:$16 sps:$4 sm:$0xff]  }
 0x173   :  { %2180 = vmatprep.subr.bf16.mxu0 %v3415_v60  ;;  %2223 = vmatprep.subr.bf16.mxu1 %v3469_v10  ;;  %v1355_v60 = vlaneseq }
 0x176   :  { %2181 = vmatpush1.bf16.msra.mxu0 %v3413_v61  ;;  %2224 = vmatpush1.bf16.msra.mxu1 %v3467_v9  ;;  %v1354_v61 = vunpack.c.0.s8 %v1353_v59 }
 0x177   :  { %2182 = vmatprep.subr.bf16.mxu0 %v3418_v62  ;;  %2225 = vmatprep.subr.bf16.mxu1 %v3475_v14  ;;  %v1356_v62 = vshrl.u32 %v1355_v60, 7 }
 0x179   :  { %v3863_v5 = vsub.s32 0, %v1356_v62 }
 0x17a   :  { %2183 = vmatpush1.bf16.msra.mxu0 %v3416_v63  ;;  %2226 = vmatpush1.bf16.msra.mxu1 %v3473_v13  ;;  %v2945_v63 = vld.sshfl [vmem:[%s3901_s3] sm:$0x33 pattern:$0x75316420] }
 0x17b   :  { %2184 = vmatprep.subr.bf16.mxu0 %v3421_v0  ;;  %2227 = vmatprep.subr.bf16.mxu1 %v3481_v18  ;;  %v3853_v0 = vsub.s32 %v1354_v61, %v1356_v62 }
 0x17d   :  { %v3856_v2 = vrot.slane %v2945_v63, %v3853_v0 }
 0x17e   :  { %2185 = vmatpush1.bf16.msra.mxu0 %v3419_v1  ;;  %2228 = vmatpush1.bf16.msra.mxu1 %v3479_v17  ;;  %v1351_v1 = vcombine.high %v2945_v63, %v2945_v63  ;;  %v3536_v63 = vld [vmem:[#allocation8 + $0x148] ss:$16 sps:$4 sm:$0xff]  }
 0x17f   :  { %2186 = vmatprep.subr.bf16.mxu0 %v3424_v56  ;;  %2229 = vmatprep.subr.bf16.mxu1 %v3487_v22 }
 0x180   :  { %v3859_v3 = vrot.slane %v1351_v1, %v3853_v0 }
 0x182   :  { %2187 = vmatpush1.bf16.msra.mxu0 %v3422_v57  ;;  %2230 = vmatpush1.bf16.msra.mxu1 %v3485_v21 }
 0x183   :  { %2188 = vmatprep.subr.bf16.mxu0 %v3427_v4  ;;  %2231 = vmatprep.subr.bf16.mxu1 %v3493_v26  ;;  %v1369_v4 = vpack.i.b16 %v3856_v2, %v3856_v2  ;;  %v3458_v26 = vld [vmem:[#allocation8 + $0xe8] ss:$16 sps:$4 sm:$0xff]  }
 0x185   :  { %v1374_v13 = vrot.slane %v1369_v4, %v3863_v5 }
 0x186   :  { %2189 = vmatpush1.bf16.msra.mxu0 %v3425_v7  ;;  %2232 = vmatpush1.bf16.msra.mxu1 %v3491_v25 }
 0x187   :  { %2190 = vmatprep.subr.bf16.mxu0 %v3430_v8  ;;  %2233 = vmatprep.subr.bf16.mxu1 %v3499_v30  ;;  %v1376_v8 = vpack.i.b16 %v3859_v3, %v3859_v3  ;;  %v3472_v30 = vld [vmem:[#allocation8 + $0xac] ss:$16 sps:$4 sm:$0xff]  }
 0x18a   :  { %2191 = vmatpush1.bf16.msra.mxu0 %v3428_v11  ;;  %2234 = vmatpush1.bf16.msra.mxu1 %v3497_v29  ;;  %v3464_v29 = vld [vmem:[#allocation8 + $0xc8] ss:$16 sps:$4 sm:$0xff]  }
 0x18b   :  { %2192 = vmatprep.subr.bf16.mxu0 %v3433_v12  ;;  %2235 = vmatprep.subr.bf16.mxu1 %v3505_v34  ;;  %v3484_v34 = vld [vmem:[#allocation8 + $0x6c] ss:$16 sps:$4 sm:$0xff]  }
 0x18e   :  { %2193 = vmatpush2.bf16.msra.mxu0 %v3431_v15  ;;  %2236 = vmatpush2.bf16.msra.mxu1 %v3503_v33  ;;  %v3476_v33 = vld [vmem:[#allocation8 + $0x88] ss:$16 sps:$4 sm:$0xff]  }
 0x18f   :  { %2194 = vmatprep.subr.bf16.mxu0 %v3436_v16  ;;  %2237 = vmatprep.subr.bf16.mxu1 %v3511_v38  ;;  %v3496_v38 = vld [vmem:[#allocation8 + $0x2c] ss:$16 sps:$4 sm:$0xff]  }
 0x192   :  { %2195 = vmatpush2.bf16.msra.mxu0 %v3434_v19  ;;  %2238 = vmatpush2.bf16.msra.mxu1 %v3509_v37  ;;  %v1381_v19 = vrot.slane %v1376_v8, %v3863_v5  ;;  %v3488_v37 = vld [vmem:[#allocation8 + $0x48] ss:$16 sps:$4 sm:$0xff]  }
 0x193   :  { %2196 = vmatprep.subr.bf16.mxu0 %v3439_v20  ;;  %2239 = vmatprep.subr.bf16.mxu1 %v3517_v42  ;;  %v3508_v42 = vld [vmem:[#allocation8 + $0x1ec] ss:$16 sps:$4 sm:$0xff]  }
 0x196   :  { %2197 = vmatpush2.bf16.msra.mxu0 %v3437_v23  ;;  %2240 = vmatpush2.bf16.msra.mxu1 %v3515_v41  ;;  %v3500_v41 = vld [vmem:[#allocation8 + $0x8] ss:$16 sps:$4 sm:$0xff]  }
 0x197   :  { %2198 = vmatprep.subr.bf16.mxu0 %v3442_v24  ;;  %2241 = vmatprep.subr.bf16.mxu1 %v3523_v46  ;;  %v3520_v46 = vld [vmem:[#allocation8 + $0x1ac] ss:$16 sps:$4 sm:$0xff]  }
 0x19a   :  { %2199 = vmatpush2.bf16.msra.mxu0 %v3440_v27  ;;  %2242 = vmatpush2.bf16.msra.mxu1 %v3521_v45  ;;  %v3512_v45 = vld [vmem:[#allocation8 + $0x1c8] ss:$16 sps:$4 sm:$0xff]  }
 0x19b   :  { %2200 = vmatprep.subr.bf16.mxu0 %v3445_v28  ;;  %2243 = vmatprep.subr.bf16.mxu1 %v3529_v47  ;;  %v3466_v28 = vld [vmem:[#allocation8 + $0xcc] ss:$16 sps:$4 sm:$0xff]   ;;  %v3518_v47 = vld [vmem:[#allocation8 + $0x1a8] ss:$16 sps:$4 sm:$0xff]  }
 0x19e   :  { %2201 = vmatpush2.bf16.msra.mxu0 %v3443_v31  ;;  %2244 = vmatpush2.bf16.msra.mxu1 %v3527_v48  ;;  %v3470_v31 = vld [vmem:[#allocation8 + $0xa8] ss:$16 sps:$4 sm:$0xff]   ;;  %v3526_v48 = vld [vmem:[#allocation8 + $0x18c] ss:$16 sps:$4 sm:$0xff]  }
 0x19f   :  { %2202 = vmatprep.subr.bf16.mxu0 %v3448_v32  ;;  %2245 = vmatprep.subr.bf16.mxu1 %v3535_v49  ;;  %v3478_v32 = vld [vmem:[#allocation8 + $0x8c] ss:$16 sps:$4 sm:$0xff]   ;;  %v3524_v49 = vld [vmem:[#allocation8 + $0x188] ss:$16 sps:$4 sm:$0xff]  }
 0x1a2   :  { %2203 = vmatpush2.bf16.msra.mxu0 %v3446_v35  ;;  %2246 = vmatpush2.bf16.msra.mxu1 %v3533_v50  ;;  %v3482_v35 = vld [vmem:[#allocation8 + $0x68] ss:$16 sps:$4 sm:$0xff]   ;;  %v3532_v50 = vld [vmem:[#allocation8 + $0x16c] ss:$16 sps:$4 sm:$0xff]  }
 0x1a3   :  { %2204 = vmatprep.subr.bf16.mxu0 %v3451_v36  ;;  %2247 = vmatprep.subr.bf16.mxu1 %v3541_v51  ;;  %v3490_v36 = vld [vmem:[#allocation8 + $0x4c] ss:$16 sps:$4 sm:$0xff]   ;;  %v1366_v51 = vcombine.high %v3856_v2, %v3856_v2 }
 0x1a5   :  { %v1383_v59 = vpack.i.b16 %v1366_v51, %v1366_v51  ;;  %v3586_v51 = vld [vmem:[#allocation8 + $0x38c] ss:$16 sps:$4 sm:$0xff]  }
 0x1a6   :  { %2205 = vmatpush2.bf16.msra.mxu0 %v3449_v39  ;;  %2248 = vmatpush2.bf16.msra.mxu1 %v3539_v52  ;;  %v3494_v39 = vld [vmem:[#allocation8 + $0x28] ss:$16 sps:$4 sm:$0xff]  }
 0x1a7   :  { %2206 = vmatprep.subr.bf16.mxu0 %v3454_v40  ;;  %2249 = vmatprep.subr.bf16.mxu1 %v3547_v53  ;;  %v3502_v40 = vld [vmem:[#allocation8 + $0xc] ss:$16 sps:$4 sm:$0xff]   ;;  %v3530_v52 = vld [vmem:[#allocation8 + $0x168] ss:$16 sps:$4 sm:$0xff]   ;;  %v1367_v53 = vcombine.high %v3859_v3, %v3859_v3 }
 0x1a9   :  { %v1390_v62 = vpack.i.b16 %v1367_v53, %v1367_v53  ;;  %v3589_v53 = vld [vmem:[#allocation8 + $0x36c] ss:$16 sps:$4 sm:$0xff]  }
 0x1aa   :  { %2207 = vmatpush2.bf16.msra.mxu0 %v3452_v43  ;;  %2250 = vmatpush2.bf16.msra.mxu1 %v3545_v54  ;;  %v3506_v43 = vld [vmem:[#allocation8 + $0x1e8] ss:$16 sps:$4 sm:$0xff]  }
 0x1ab   :  { %2262 = vmatprep.subr.bf16.mxu0 %v3460_v44  ;;  %2305 = vmatprep.subr.bf16.mxu1 %v3553_v55  ;;  %v3514_v44 = vld [vmem:[#allocation8 + $0x1cc] ss:$16 sps:$4 sm:$0xff]  }
 0x1ed   :  { %v1200_v56 = vpop.f32.mrf.mxu0  ;;  %v1243_v57 = vpop.f32.mrf.mxu1 }
 0x1ee   :  { %v1244_v11 = vadd.f32 %v1243_v57, %v1200_v56  ;;  %v3544_v57 = vld [vmem:[#allocation8 + $0x12c] ss:$16 sps:$4 sm:$0xff]  }
 0x1ef   :  { %v1202_v6 = vpop.f32.mrf.mxu0  ;;  %v1245_v7 = vpop.f32.mrf.mxu1 }
 0x1f0   :  { %v1246_v16 = vadd.f32 %v1245_v7, %v1202_v6  ;;  %v1388_v6 = vrot.slane %v1383_v59, %v3863_v5  ;;  %v3595_v59 = vld [vmem:[#allocation8 + $0x32c] ss:$16 sps:$4 sm:$0xff]  }
 0x1f1   :  { %v1204_v9 = vpop.f32.mrf.mxu0  ;;  %v1247_v10 = vpop.f32.mrf.mxu1 }
 0x1f2   :  { %v1248_v12 = vadd.f32 %v1247_v10, %v1204_v9 }
 0x1f3   :  { %v1206_v14 = vpop.f32.mrf.mxu0  ;;  %v1249_v15 = vpop.f32.mrf.mxu1 }
 0x1f4   :  { %v1338_v17 = vpack.c.bf16 %v1248_v12, %v1244_v11  ;;  %v1250_v18 = vadd.f32 %v1249_v15, %v1206_v14  ;;  %v1395_v11 = vrot.slane %v1390_v62, %v3863_v5  ;;  %v3542_v12 = vld [vmem:[#allocation8 + $0x128] ss:$16 sps:$4 sm:$0xff]  }
 0x1f5   :  { %v3596_v62 = vld [vmem:[#allocation8 + $0x308] ss:$16 sps:$4 sm:$0xff]  }
 0x1f6   :  { %v1396_v20 = vadd.bf16 %v1374_v13, %v1338_v17  ;;  %v1339_v21 = vpack.c.bf16 %v1250_v18, %v1246_v16  ;;  %v3550_v13 = vld [vmem:[#allocation8 + $0x10c] ss:$16 sps:$4 sm:$0xff]   ;;  %v3548_v17 = vld [vmem:[#allocation8 + $0x108] ss:$16 sps:$4 sm:$0xff]  }
 0x1f8   :  { %v1397_v22 = vadd.bf16 %v1381_v19, %v1339_v21  ;;  %v1400_v23 = vmul.bf16 1009007652, %v1396_v20  ;;  %v3551_v21 = vld [vmem:[#allocation8 + $0x2e8] ss:$16 sps:$4 sm:$0xff]  }
 0x1fa   :  { %v1401_v24 = vmul.bf16 1009007652, %v1397_v22  ;;  %v3869_v27 = vmax.bf16 %v1400_v23, %v1396_v20  ;;  %v3556_v23 = vld [vmem:[#allocation8 + $0x2cc] ss:$16 sps:$4 sm:$0xff]  }
 0x1fc   :  { %v1405_v25 = vmax.bf16 %v1401_v24, %v1397_v22  ;;  %v3554_v24 = vld [vmem:[#allocation8 + $0x2c8] ss:$16 sps:$4 sm:$0xff]  }
 0x1fe   :  { %2208 = vmatprep.mubr.bf16.mxu0 %v1405_v25 }
 0x1ff   :  { %2209 = vmatmul.mubr.bf16.vlgmr.msra.gmra.mxu0 %v3869_v27 }
 0x200   :  { %2263 = vmatpush1.bf16.msra.mxu0 %v3458_v26  ;;  %2294 = vmatprep.mubr.bf16.mxu0 %v1405_v25  ;;  %v3559_v25 = vld [vmem:[#allocation8 + $0x2ac] ss:$16 sps:$4 sm:$0xff]   ;;  %v3557_v26 = vld [vmem:[#allocation8 + $0x2a8] ss:$16 sps:$4 sm:$0xff]  }
 0x201   :  { %2264 = vmatprep.subr.bf16.mxu0 %v3466_v28  ;;  %v3562_v28 = vld [vmem:[#allocation8 + $0x28c] ss:$16 sps:$4 sm:$0xff]  }
 0x204   :  { %2265 = vmatpush1.bf16.msra.mxu0 %v3464_v29  ;;  %v3599_v29 = vld [vmem:[#allocation10 + $0x78] sm:$0xff]  }
 0x205   :  { %2266 = vmatprep.subr.bf16.mxu0 %v3472_v30  ;;  %v3600_v30 = vld [vmem:[#allocation10 + $0x38] sm:$0xff]  }
 0x208   :  { %2267 = vmatpush1.bf16.msra.mxu0 %v3470_v31  ;;  %v3601_v31 = vld [vmem:[#allocation10 + $0x70] sm:$0xff]  }
 0x209   :  { %2268 = vmatprep.subr.bf16.mxu0 %v3478_v32  ;;  %v3560_v32 = vld [vmem:[#allocation8 + $0x288] ss:$16 sps:$4 sm:$0xff]  }
 0x20c   :  { %2269 = vmatpush1.bf16.msra.mxu0 %v3476_v33  ;;  %v3602_v33 = vld [vmem:[#allocation10 + $0x30] sm:$0xff]  }
 0x20d   :  { %2270 = vmatprep.subr.bf16.mxu0 %v3484_v34  ;;  %v3565_v34 = vld [vmem:[#allocation8 + $0x26c] ss:$16 sps:$4 sm:$0xff]  }
 0x210   :  { %2271 = vmatpush1.bf16.msra.mxu0 %v3482_v35  ;;  %v3563_v35 = vld [vmem:[#allocation8 + $0x268] ss:$16 sps:$4 sm:$0xff]  }
 0x211   :  { %2272 = vmatprep.subr.bf16.mxu0 %v3490_v36  ;;  %v3604_v36 = vld [vmem:[#allocation10 + $0x28] sm:$0xff]  }
 0x214   :  { %2273 = vmatpush1.bf16.msra.mxu0 %v3488_v37  ;;  %v3568_v37 = vld [vmem:[#allocation8 + $0x24c] ss:$16 sps:$4 sm:$0xff]  }
 0x215   :  { %2274 = vmatprep.subr.bf16.mxu0 %v3496_v38  ;;  %v3605_v38 = vld [vmem:[#allocation10 + $0x60] sm:$0xff]  }
 0x218   :  { %2275 = vmatpush1.bf16.msra.mxu0 %v3494_v39  ;;  %v3566_v39 = vld [vmem:[#allocation8 + $0x248] ss:$16 sps:$4 sm:$0xff]  }
 0x219   :  { %2276 = vmatprep.subr.bf16.mxu0 %v3502_v40  ;;  %v3606_v40 = vld [vmem:[#allocation10 + $0x20] sm:$0xff]  }
 0x21c   :  { %2277 = vmatpush1.bf16.msra.mxu0 %v3500_v41  ;;  %v3571_v41 = vld [vmem:[#allocation8 + $0x22c] ss:$16 sps:$4 sm:$0xff]  }
 0x21d   :  { %2278 = vmatprep.subr.bf16.mxu0 %v3508_v42  ;;  %v3569_v42 = vld [vmem:[#allocation8 + $0x228] ss:$16 sps:$4 sm:$0xff]  }
 0x220   :  { %2279 = vmatpush2.bf16.msra.mxu0 %v3506_v43  ;;  %v3574_v43 = vld [vmem:[#allocation8 + $0x20c] ss:$16 sps:$4 sm:$0xff]  }
 0x221   :  { %2280 = vmatprep.subr.bf16.mxu0 %v3514_v44  ;;  %v3572_v44 = vld [vmem:[#allocation8 + $0x208] ss:$16 sps:$4 sm:$0xff]  }
 0x224   :  { %2281 = vmatpush2.bf16.msra.mxu0 %v3512_v45  ;;  %v3577_v45 = vld [vmem:[#allocation8 + $0x3ec] ss:$16 sps:$4 sm:$0xff]  }
 0x225   :  { %2282 = vmatprep.subr.bf16.mxu0 %v3520_v46  ;;  %v3575_v46 = vld [vmem:[#allocation8 + $0x3e8] ss:$16 sps:$4 sm:$0xff]  }
 0x228   :  { %2283 = vmatpush2.bf16.msra.mxu0 %v3518_v47  ;;  %v3580_v47 = vld [vmem:[#allocation8 + $0x3cc] ss:$16 sps:$4 sm:$0xff]  }
 0x229   :  { %2284 = vmatprep.subr.bf16.mxu0 %v3526_v48  ;;  %v3578_v48 = vld [vmem:[#allocation8 + $0x3c8] ss:$16 sps:$4 sm:$0xff]  }
 0x22c   :  { %2285 = vmatpush2.bf16.msra.mxu0 %v3524_v49  ;;  %v3583_v49 = vld [vmem:[#allocation8 + $0x3ac] ss:$16 sps:$4 sm:$0xff]  }
 0x22d   :  { %v1286_v54 = vpop.f32.mrf.mxu0  ;;  %v1329_v55 = vpop.f32.mrf.mxu1  ;;  %2286 = vmatprep.subr.bf16.mxu0 %v3532_v50  ;;  %v3581_v50 = vld [vmem:[#allocation8 + $0x3a8] ss:$16 sps:$4 sm:$0xff]  }
 0x22e   :  { %v1330_v2 = vadd.f32 %v1329_v55, %v1286_v54  ;;  %v3587_v54 = vld [vmem:[#allocation8 + $0x368] ss:$16 sps:$4 sm:$0xff]   ;;  %v3592_v55 = vld [vmem:[#allocation8 + $0x34c] ss:$16 sps:$4 sm:$0xff]  }
 0x22f   :  { %v1288_v60 = vpop.f32.mrf.mxu0  ;;  %v1331_v61 = vpop.f32.mrf.mxu1 }
 0x230   :  { %2287 = vmatpush2.bf16.msra.mxu0 %v3530_v52  ;;  %v1332_v8 = vadd.f32 %v1331_v61, %v1288_v60  ;;  %v3584_v52 = vld [vmem:[#allocation8 + $0x388] ss:$16 sps:$4 sm:$0xff]   ;;  %v3598_v61 = vld [vmem:[#allocation8 + $0x30c] ss:$16 sps:$4 sm:$0xff]  }
 0x231   :  { %v1290_v1 = vpop.f32.mrf.mxu0  ;;  %v1333_v56 = vpop.f32.mrf.mxu1  ;;  %2288 = vmatprep.subr.bf16.mxu0 %v3538_v58  ;;  %v3590_v58 = vld [vmem:[#allocation8 + $0x348] ss:$16 sps:$4 sm:$0xff]  }
 0x232   :  { %v1334_v4 = vadd.f32 %v1333_v56, %v1290_v1  ;;  %v3593_v60 = vld [vmem:[#allocation8 + $0x328] ss:$16 sps:$4 sm:$0xff]   ;;  %v3609_v56 = vld [vmem:[#allocation10 + $0x50] sm:$0xff]  }
 0x233   :  { %v1292_v7 = vpop.f32.mrf.mxu0  ;;  %v1335_v3 = vpop.f32.mrf.mxu1  ;;  %v3608_v1 = vld [vmem:[#allocation10 + $0x18] sm:$0xff]  }
 0x234   :  { %v1340_v9 = vpack.c.bf16 %v1334_v4, %v1330_v2  ;;  %v1336_v10 = vadd.f32 %v1335_v3, %v1292_v7  ;;  %2289 = vmatpush2.bf16.msra.mxu0 %v3536_v63  ;;  %v3607_v63 = vld [vmem:[#allocation10 + $0x58] sm:$0xff]   ;;  %v3611_v2 = vld [vmem:[#allocation10 + $0x48] sm:$0xff]   ;;  %v3614_v7 = vld [vmem:[#allocation10] sm:$0xff]  }
 0x235   :  { %2290 = vmatprep.subr.bf16.mxu0 %v3544_v57  ;;  %v3610_v57 = vld [vmem:[#allocation10 + $0x10] sm:$0xff]   ;;  %v3612_v4 = vld [vmem:[#allocation10 + $0x8] sm:$0xff]   ;;  %v3615_v3 = vld [vmem:[#allocation10 + $0xf8] sm:$0xff]  }
 0x236   :  { %v1398_v14 = vadd.bf16 %v1388_v6, %v1340_v9  ;;  %v1341_v15 = vpack.c.bf16 %v1336_v10, %v1332_v8  ;;  %v3613_v6 = vld [vmem:[#allocation10 + $0x40] sm:$0xff]   ;;  %v3616_v8 = vld [vmem:[#allocation10 + $0xb8] sm:$0xff]   ;;  %v3617_v9 = vld [vmem:[#allocation10 + $0xf0] sm:$0xff]  }
 0x237   :  { %v3618_v10 = vld [vmem:[#allocation10 + $0xb0] sm:$0xff]  }
 0x238   :  { %v1399_v16 = vadd.bf16 %v1395_v11, %v1341_v15  ;;  %2291 = vmatpush2.bf16.msra.mxu0 %v3542_v12  ;;  %v1402_v18 = vmul.bf16 1009007652, %v1398_v14  ;;  %v3619_v11 = vld [vmem:[#allocation10 + $0xe8] sm:$0xff]   ;;  %v3623_v15 = vld [vmem:[#allocation10 + $0xd8] sm:$0xff]  }
 0x239   :  { %2292 = vmatprep.subr.bf16.mxu0 %v3550_v13  ;;  %v3620_v12 = vld [vmem:[#allocation10 + $0xa8] sm:$0xff]   ;;  %v3621_v13 = vld [vmem:[#allocation10 + $0xe0] sm:$0xff]  }
 0x23a   :  { %v1403_v19 = vmul.bf16 1009007652, %v1399_v16  ;;  %v3878_v22 = vmax.bf16 %v1402_v18, %v1398_v14  ;;  %v3622_v14 = vld [vmem:[#allocation10 + $0xa0] sm:$0xff]   ;;  %v3626_v18 = vld [vmem:[#allocation10 + $0x90] sm:$0xff]  }
 0x23c   :  { %2293 = vmatpush2.bf16.msra.mxu0 %v3548_v17  ;;  %v1407_v20 = vmax.bf16 %v1403_v19, %v1399_v16  ;;  %v3624_v16 = vld [vmem:[#allocation10 + $0x98] sm:$0xff]   ;;  %v3625_v17 = vld [vmem:[#allocation10 + $0xd0] sm:$0xff]   ;;  %v3627_v19 = vld [vmem:[#allocation10 + $0xc8] sm:$0xff]  }
 0x23d   :  { %3108 = vmatprep.subr.bf16.mxu0 %v3599_v29 }
 0x23e   :  { %2251 = vmatprep.mubr.bf16.mxu1 %v1407_v20 }
 0x23f   :  { %2252 = vmatmul.mubr.bf16.vlgmr.msra.gmra.mxu1 %v3878_v22  ;;  %2295 = vmatmul.mubr.bf16.vlgmr.msra.gmra.mxu0 %v3869_v27  ;;  %v3603_v27 = vld [vmem:[#allocation10 + $0x68] sm:$0xff]  }
 0x240   :  { %2306 = vmatpush1.bf16.msra.mxu1 %v3551_v21  ;;  %2337 = vmatprep.mubr.bf16.mxu1 %v1407_v20  ;;  %v3628_v20 = vld [vmem:[#allocation10 + $0x88] sm:$0xff]   ;;  %v3629_v21 = vld [vmem:[#allocation10 + $0xc0] sm:$0xff]  }
 0x241   :  { %2307 = vmatprep.subr.bf16.mxu1 %v3556_v23  ;;  %3109 = vmatpush3.bf16.msra.mxu0 %v3600_v30  ;;  %v3074_v23 = vld.sshfl [vmem:[%s3903_s5] sm:$0x33 pattern:$0x75316420] }
 0x242   :  { %3110 = vmatprep.subr.bf16.mxu0 %v3601_v31 }
 0x244   :  { %2308 = vmatpush1.bf16.msra.mxu1 %v3554_v24 }
 0x245   :  { %2309 = vmatprep.subr.bf16.mxu1 %v3559_v25  ;;  %3111 = vmatpush3.bf16.msra.mxu0 %v3602_v33  ;;  %v2361_v25 = vcombine.high %v3074_v23, %v3074_v23 }
 0x246   :  { %3112 = vmatprep.subr.bf16.mxu0 %v3603_v27 }
 0x247   :  { %v2375_v29 = vrot.slane %v2361_v25, %v3853_v0 }
 0x248   :  { %2310 = vmatpush1.bf16.msra.mxu1 %v3557_v26  ;;  %v2368_v26 = vrot.slane %v3074_v23, %v3853_v0 }
 0x249   :  { %2311 = vmatprep.subr.bf16.mxu1 %v3562_v28  ;;  %3113 = vmatpush3.bf16.msra.mxu0 %v3604_v36 }
 0x24a   :  { %3114 = vmatprep.subr.bf16.mxu0 %v3605_v38  ;;  %v2379_v31 = vpack.i.b16 %v2368_v26, %v2368_v26 }
 0x24c   :  { %2312 = vmatpush1.bf16.msra.mxu1 %v3560_v32 }
 0x24d   :  { %2313 = vmatprep.subr.bf16.mxu1 %v3565_v34  ;;  %3115 = vmatpush3.bf16.msra.mxu0 %v3606_v40  ;;  %v2386_v34 = vpack.i.b16 %v2375_v29, %v2375_v29 }
 0x24e   :  { %3116 = vmatprep.subr.bf16.mxu0 %v3607_v63 }
 0x250   :  { %2314 = vmatpush1.bf16.msra.mxu1 %v3563_v35 }
 0x251   :  { %2315 = vmatprep.subr.bf16.mxu1 %v3568_v37  ;;  %3117 = vmatpush3.bf16.msra.mxu0 %v3608_v1  ;;  %v2384_v37 = vrot.slane %v2379_v31, %v3863_v5 }
 0x252   :  { %3118 = vmatprep.subr.bf16.mxu0 %v3609_v56 }
 0x254   :  { %2316 = vmatpush1.bf16.msra.mxu1 %v3566_v39 }
 0x255   :  { %2317 = vmatprep.subr.bf16.mxu1 %v3571_v41  ;;  %3119 = vmatpush3.bf16.msra.mxu0 %v3610_v57 }
 0x256   :  { %3120 = vmatprep.subr.bf16.mxu0 %v3611_v2 }
 0x258   :  { %2318 = vmatpush1.bf16.msra.mxu1 %v3569_v42 }
 0x259   :  { %2319 = vmatprep.subr.bf16.mxu1 %v3574_v43  ;;  %3121 = vmatpush3.bf16.msra.mxu0 %v3612_v4  ;;  %v2391_v43 = vrot.slane %v2386_v34, %v3863_v5 }
 0x25a   :  { %3122 = vmatprep.subr.bf16.mxu0 %v3613_v6 }
 0x25c   :  { %2320 = vmatpush1.bf16.msra.mxu1 %v3572_v44 }
 0x25d   :  { %2321 = vmatprep.subr.bf16.mxu1 %v3577_v45  ;;  %3123 = vmatpush3.bf16.msra.mxu0 %v3614_v7 }
 0x260   :  { %2322 = vmatpush2.bf16.msra.mxu1 %v3575_v46 }
 0x261   :  { %2323 = vmatprep.subr.bf16.mxu1 %v3580_v47 }
 0x264   :  { %2324 = vmatpush2.bf16.msra.mxu1 %v3578_v48 }
 0x265   :  { %2325 = vmatprep.subr.bf16.mxu1 %v3583_v49 }
 0x268   :  { %2326 = vmatpush2.bf16.msra.mxu1 %v3581_v50 }
 0x269   :  { %2327 = vmatprep.subr.bf16.mxu1 %v3586_v51  ;;  %v2376_v51 = vcombine.high %v2368_v26, %v2368_v26 }
 0x26c   :  { %2328 = vmatpush2.bf16.msra.mxu1 %v3584_v52 }
 0x26d   :  { %2329 = vmatprep.subr.bf16.mxu1 %v3589_v53  ;;  %v2377_v53 = vcombine.high %v2375_v29, %v2375_v29 }
 0x270   :  { %2330 = vmatpush2.bf16.msra.mxu1 %v3587_v54 }
 0x271   :  { %2331 = vmatprep.subr.bf16.mxu1 %v3592_v55  ;;  %v2393_v55 = vpack.i.b16 %v2376_v51, %v2376_v51 }
 0x273   :  { %v2398_v1 = vrot.slane %v2393_v55, %v3863_v5 }
 0x274   :  { %2332 = vmatpush2.bf16.msra.mxu1 %v3590_v58 }
 0x275   :  { %2333 = vmatprep.subr.bf16.mxu1 %v3595_v59 }
 0x278   :  { %2334 = vmatpush2.bf16.msra.mxu1 %v3593_v60  ;;  %v2400_v60 = vpack.i.b16 %v2377_v53, %v2377_v53 }
 0x279   :  { %2335 = vmatprep.subr.bf16.mxu1 %v3598_v61 }
 0x27a   :  { %v2405_v7 = vrot.slane %v2400_v60, %v3863_v5 }
 0x27c   :  { %2336 = vmatpush2.bf16.msra.mxu1 %v3596_v62 }
 0x27d   :  { %3130 = vmatprep.subr.bf16.mxu1 %v3615_v3 }
 0x27f   :  { %2338 = vmatmul.mubr.bf16.vlgmr.msra.gmra.mxu1 %v3878_v22  ;;  %v3630_v22 = vld [vmem:[#allocation10 + $0x80] sm:$0xff]  }
 0x280   :  { %3131 = vmatpush3.bf16.msra.mxu1 %v3616_v8 }
 0x281   :  { %3132 = vmatprep.subr.bf16.mxu1 %v3617_v9 }
 0x284   :  { %3133 = vmatpush3.bf16.msra.mxu1 %v3618_v10 }
 0x285   :  { %3134 = vmatprep.subr.bf16.mxu1 %v3619_v11 }
 0x288   :  { %3135 = vmatpush3.bf16.msra.mxu1 %v3620_v12 }
 0x289   :  { %3136 = vmatprep.subr.bf16.mxu1 %v3621_v13 }
 0x28c   :  { %3137 = vmatpush3.bf16.msra.mxu1 %v3622_v14 }
 0x28d   :  { %3138 = vmatprep.subr.bf16.mxu1 %v3623_v15 }
 0x290   :  { %3139 = vmatpush3.bf16.msra.mxu1 %v3624_v16 }
 0x291   :  { %3140 = vmatprep.subr.bf16.mxu1 %v3625_v17 }
 0x294   :  { %3141 = vmatpush3.bf16.msra.mxu1 %v3626_v18  ;;  %v3075_v18 = vld [vmem:[%s3905_s7] ss:$0 sm:$0xff] }
 0x295   :  { %3142 = vmatprep.subr.bf16.mxu1 %v3627_v19 }
 0x298   :  { %3143 = vmatpush3.bf16.msra.mxu1 %v3628_v20 }
 0x299   :  { %3144 = vmatprep.subr.bf16.mxu1 %v3629_v21 }
 0x29c   :  { %3145 = vmatpush3.bf16.msra.mxu1 %v3630_v22 }
 0x2bf   :  { %v2210_v24 = vpop.f32.mrf.mxu0 }
 0x2c1   :  { %v2212_v28 = vpop.f32.mrf.mxu0 }
 0x2c3   :  { %v2214_v32 = vpop.f32.mrf.mxu0 }
 0x2c5   :  { %v2216_v38 = vpop.f32.mrf.mxu0 }
 0x2ff   :  { %v2253_v30 = vpop.f32.mrf.mxu1  ;;  %v2296_v50 = vpop.f32.mrf.mxu0 }
 0x300   :  { %v2254_v35 = vadd.f32 %v2253_v30, %v2210_v24 }
 0x301   :  { %v2255_v33 = vpop.f32.mrf.mxu1  ;;  %v2298_v52 = vpop.f32.mrf.mxu0 }
 0x302   :  { %v2256_v40 = vadd.f32 %v2255_v33, %v2212_v28 }
 0x303   :  { %v2257_v27 = vpop.f32.mrf.mxu1  ;;  %v2300_v58 = vpop.f32.mrf.mxu0 }
 0x304   :  { %v2258_v36 = vadd.f32 %v2257_v27, %v2214_v32 }
 0x305   :  { %v2259_v39 = vpop.f32.mrf.mxu1  ;;  %v2302_v56 = vpop.f32.mrf.mxu0 }
 0x306   :  { %v2348_v41 = vpack.c.bf16 %v2258_v36, %v2254_v35  ;;  %v2260_v42 = vadd.f32 %v2259_v39, %v2216_v38 }
 0x308   :  { %v2406_v44 = vadd.bf16 %v2384_v37, %v2348_v41  ;;  %v2349_v45 = vpack.c.bf16 %v2260_v42, %v2256_v40 }
 0x30a   :  { %v2407_v0 = vadd.bf16 %v2391_v43, %v2349_v45  ;;  %v2410_v46 = vmul.bf16 1009007652, %v2406_v44 }
 0x30c   :  { %v2411_v47 = vmul.bf16 1009007652, %v2407_v0  ;;  %v2414_v49 = vmax.bf16 %v2410_v46, %v2406_v44 }
 0x30e   :  { %v2415_v48 = vmax.bf16 %v2411_v47, %v2407_v0 }
 0x310   :  { %2713 = vmatprep.mubr.bf16.mxu0 %v2415_v48 }
 0x311   :  { %2714 = vmatmul.mubr.bf16.vlgmr.msra.gmra.mxu0 %v2414_v49 }
 0x33f   :  { %v2339_v54 = vpop.f32.mrf.mxu1 }
 0x340   :  { %v2340_v62 = vadd.f32 %v2339_v54, %v2296_v50 }
 0x341   :  { %v2341_v59 = vpop.f32.mrf.mxu1 }
 0x342   :  { %v2342_v2 = vadd.f32 %v2341_v59, %v2298_v52 }
 0x343   :  { %v2343_v61 = vpop.f32.mrf.mxu1 }
 0x344   :  { %v2344_v63 = vadd.f32 %v2343_v61, %v2300_v58 }
 0x345   :  { %v2345_v57 = vpop.f32.mrf.mxu1 }
 0x346   :  { %v2350_v4 = vpack.c.bf16 %v2344_v63, %v2340_v62  ;;  %v2346_v6 = vadd.f32 %v2345_v57, %v2302_v56 }
 0x348   :  { %v2408_v3 = vadd.bf16 %v2398_v1, %v2350_v4  ;;  %v2351_v8 = vpack.c.bf16 %v2346_v6, %v2342_v2 }
 0x34a   :  { %v2409_v9 = vadd.bf16 %v2405_v7, %v2351_v8  ;;  %v2412_v10 = vmul.bf16 1009007652, %v2408_v3 }
 0x34c   :  { %v2413_v11 = vmul.bf16 1009007652, %v2409_v9  ;;  %v2416_v13 = vmax.bf16 %v2412_v10, %v2408_v3 }
 0x34e   :  { %v2417_v12 = vmax.bf16 %v2413_v11, %v2409_v9 }
 0x350   :  { %2754 = vmatprep.mubr.bf16.mxu1 %v2417_v12 }
 0x351   :  { %2755 = vmatmul.mubr.bf16.vlgmr.msra.gmra.mxu1 %v2416_v13 }
 0x3d1   :  { %v3124_v14 = vpop.f32.mrf.mxu0 }
 0x3d3   :  { %v3125_v15 = vpop.f32.mrf.mxu0 }
 0x3d4   :  { %v3126_v17 = vadd.f32 %v3125_v15, %v3124_v14 }
 0x3d5   :  { %v3127_v16 = vpop.f32.mrf.mxu0 }
 0x3d6   :  { %v2716_v21 = vadd.f32 %v3126_v17, %v3075_v18 }
 0x3d7   :  { %v3128_v19 = vpop.f32.mrf.mxu0 }
 0x3d8   :  { %v3129_v22 = vadd.f32 %v3128_v19, %v3127_v16 }
 0x3da   :  { %v2719_v28 = vadd.f32 %v3129_v22, %v3075_v18 }
 0x411   :  { %v3146_v20 = vpop.f32.mrf.mxu1 }
 0x413   :  { %v3147_v5 = vpop.f32.mrf.mxu1 }
 0x414   :  { %v3148_v23 = vadd.f32 %v3147_v5, %v3146_v20 }
 0x415   :  { %v3149_v24 = vpop.f32.mrf.mxu1 }
 0x416   :  { %v2757_v25 = vadd.f32 %v3148_v23, %v2716_v21 }
 0x417   :  { %v3150_v26 = vpop.f32.mrf.mxu1 }
 0x418   :  { %2763 = vst [vmem:[#allocation11] sm:$0xff] %v2757_v25  ;;  %v3151_v29 = vadd.f32 %v3150_v26, %v3149_v24 }
 0x41a   :  { %v2760_v30 = vadd.f32 %v3151_v29, %v2719_v28 }
 0x41c   :  { %2764 = vst [vmem:[#allocation11 + $0x8] sm:$0xff] %v2760_v30 }
 0x41d   :  { %3742 = shalt.err (!%p3739_p1)
}
 0x41e   :  { %s3771_s7 = smov 128   ;;  %s3772_s14 = smov 8  }
 0x41f   :  { %2776 = dma.vmem_to_hbm [thread:$0]  %s2771_s12, 256, %s3906_s8, [#allocation4], %s3771_s7, %s3771_s7, %s3772_s14  }
 0x420   :  { %3757 = dma.done.wait [#allocation4], 256  }
 0x421   :  { %3758 = vsyncadd [#allocation4], 4294967040 }
 0x422   :  { %2780 = vsyncpa [#allocation3], 1 }
 0x423   :  { %2781 = vsyncpa [#allocation6], 1 }
 0x424   :  { %2782 = vsyncpa [#allocation9], 1 }
 0x425   :  { %2783 = vsyncpa [#allocation4], 1 }

</bundles_post_ra>
